<compile_context>
chip_gen: v5e
topology: v5e:2x2
jax: 0.10.0
libtpu: 0.0.40
codegen_flags: <defaults>
</compile_context>

<pallas_src>
import functools
import math

import jax
import jax.numpy as jnp
from jax.experimental import pallas as pl
from jax.experimental.pallas import tpu as pltpu

LANE = 128


def _gelu_tanh(h):
    # TODO(synk): PyTorch nn.GELU defaults to the exact (erf) GELU; the tanh
    # approximation is used here for guaranteed Mosaic lowering.
    k = jnp.float32(0.7978845608028654)  # sqrt(2/pi)
    return 0.5 * h * (1.0 + jnp.tanh(k * (h + 0.044715 * h * h * h)))


# ------------------------------ fused kernel -------------------------------

def _fused_unet_kernel(a0_ref, w1_ref, w_ref, b_ref, p_ref, c_ref, t_ref,
                       wc1_ref, bc1_ref, wc2_ref, bc2_ref,
                       wt1_ref, bt1_ref, wt2_ref, bt2_ref,
                       o_ref, *, k1, k2, k3):
    f32 = jnp.float32
    n = a0_ref.shape[0]
    a0 = a0_ref[...]                                            # (n, n) f32
    ii = jax.lax.broadcasted_iota(jnp.int32, (n, n), 0)         # node i (sublanes)
    jj = jax.lax.broadcasted_iota(jnp.int32, (n, n), 1)         # node j (lanes)
    eye_n = (ii == jj).astype(f32)

    def col_to_row(v_col):
        # Exact sublane->lane relayout of a column vector:
        #   row[j] = sum_i eye[i,j] * col[i]   (single nonzero term)
        return jnp.sum(eye_n * v_col, axis=0, keepdims=True)

    def inv_sqrt_deg(a, m_col):
        # Masked-out rows have degree 0; guard keeps rsqrt finite (their rows
        # are zero anyway, the guard only avoids inf * 0).
        deg = jnp.sum(a, axis=-1, keepdims=True)
        return jax.lax.rsqrt(deg + (1.0 - m_col))

    def gcn(a, d, x, wi, bi):
        # Symmetric normalization, factored:  d * (A_hat @ (d * (x @ W))) + b
        xw = jnp.dot(x, w_ref[wi], preferred_element_type=f32) * d
        agg = jnp.dot(a, xw, preferred_element_type=f32)
        return agg * d + b_ref[bi]

    def topk_mask(h, pi, m_col, k):
        # TopKPooling as a keep mask: rank_i = #{j beats i} with a lower-index
        # tie break; kept iff rank < k.  p is pre-normalized, gate = tanh(s).
        pvec = p_ref[pi]                                        # (1, LANE)
        big = jnp.float32(1e30)
        s_raw = jnp.sum(h * pvec, axis=-1, keepdims=True)       # (n, 1)
        gate = jnp.tanh(s_raw)
        s_col = jnp.where(m_col > 0.0, s_raw, -big)             # exclude pooled-out
        s_row = col_to_row(s_col)                               # (1, n), bit-identical
        beats = (s_row > s_col) | ((s_row == s_col) & (jj < ii))
        rank = jnp.sum(beats.astype(f32), axis=-1, keepdims=True)
        keep = (rank < k).astype(f32)
        return keep, gate

    # ------------------------------- down path -----------------------------
    ones_col = jnp.ones((n, 1), f32)
    d0 = inv_sqrt_deg(a0, ones_col)
    # Node features are eye(N)  ->  X @ W1 == W1   (in_channels == N).
    xw1 = w1_ref[...] * d0
    h1 = jnp.dot(a0, xw1, preferred_element_type=f32) * d0 + b_ref[0]

    m1c, g1 = topk_mask(h1, 0, ones_col, k1)
    x1 = m1c * g1 * h1
    a1 = a0 * m1c * col_to_row(m1c)
    d1 = inv_sqrt_deg(a1, m1c)

    h2 = m1c * gcn(a1, d1, x1, 0, 1)                            # gcn2
    m2c, g2 = topk_mask(h2, 1, m1c, k2)
    x2 = m2c * g2 * h2
    a2 = a0 * m2c * col_to_row(m2c)
    d2 = inv_sqrt_deg(a2, m2c)

    h3 = m2c * gcn(a2, d2, x2, 1, 2)                            # gcn3
    m3c, g3 = topk_mask(h3, 2, m2c, k3)
    x3 = m3c * g3 * h3

    # --------------- embeddings (batch row 0, all six heads) ---------------
    hc = _gelu_tanh(jnp.dot(c_ref[...], wc1_ref[...],
                            preferred_element_type=f32) + bc1_ref[...])
    cemb = jnp.dot(hc, wc2_ref[...], preferred_element_type=f32) + bc2_ref[...]
    ht = _gelu_tanh(t_ref[...] * wt1_ref[...] + bt1_ref[...])   # time input dim 1
    temb = jnp.dot(ht, wt2_ref[...], preferred_element_type=f32) + bt2_ref[...]
    cemb0, cemb1, cemb2 = (cemb[:, 0:LANE], cemb[:, LANE:2 * LANE],
                           cemb[:, 2 * LANE:3 * LANE])
    # TODO(synk): reference forward uses `temb2` without defining it; computed
    # here from self.timeembed2 as clearly intended.
    temb0, temb1, temb2 = (temb[:, 0:LANE], temb[:, LANE:2 * LANE],
                           temb[:, 2 * LANE:3 * LANE])

    # ----------------- up path (FiLM fused, masks == unpool) ---------------
    u2 = x3 * cemb0 + m3c * temb0
    r2 = m2c * gcn(a2, d2, u2, 2, 3)                            # gcn_up1
    u1 = r2 * cemb1 + m2c * temb1
    r1 = m1c * gcn(a1, d1, u1, 3, 4)                            # gcn_up2
    u0 = r1 * cemb2 + m1c * temb2
    o_ref[...] = gcn(a0, d0, u0, 4, 5)                          # gcn_up3


# ------------------------------ kernel wrapper ------------------------------

def _vmem_spec():
    return pl.BlockSpec(memory_space=pltpu.MemorySpace.VMEM)


@functools.partial(jax.jit, static_argnames=("in_channels",))
def gcn_context_unet_forward(params, x, c, t, context_mask, *, in_channels):
    """x: [B, 1, N, N] adjacency, c: [B, n_classes], t: [B, 1], mask: [B]."""
    N = x.shape[3]
    # TODO(synk): the reference stacks per-batch edge indices into one broken
    # tensor; we use batch element 0's graph (X = eye(N) is batch-independent)
    # and batch element 0's embeddings, so the output is unbatched [N, C].
    assert params["w1"].shape[0] == N, "eye(N) node features need in_channels == N"
    eye = jnp.eye(N, dtype=jnp.float32)
    adj = (x[0, 0] != 0).astype(jnp.float32)
    a0 = jnp.where(eye > 0, jnp.float32(1.0), adj)     # PyG: unit self-loops

    # Static pooled sizes (PyG TopKPooling: k = ceil(ratio * num_nodes)).
    k1 = max(int(math.ceil(0.5 * N)), 1)
    k2 = max(int(math.ceil(0.5 * k1)), 1)
    k3 = max(int(math.ceil(0.01 * k2)), 1)

    # Context (class-masked, batch row 0, lane-padded to 128) + scalar time.
    c2d = c.reshape(c.shape[0], -1).astype(jnp.float32)
    c0 = (c2d * (1.0 - context_mask)[:, None])[0:1]
    c_row = jnp.zeros((1, LANE), jnp.float32).at[:, :c2d.shape[1]].set(c0)
    t00 = t.reshape(t.shape[0], -1)[0:1, 0:1].astype(jnp.float32)

    kernel = functools.partial(_fused_unet_kernel, k1=k1, k2=k2, k3=k3)
    args = (a0, params["w1"], params["w"], params["b"], params["p"],
            c_row, t00,
            params["wc1"], params["bc1"], params["wc2"], params["bc2"],
            params["wt1"], params["bt1"], params["wt2"], params["bt2"])
    out = pl.pallas_call(
        kernel,
        out_shape=jax.ShapeDtypeStruct((N, LANE), jnp.float32),
        in_specs=[_vmem_spec() for _ in args],
        out_specs=_vmem_spec(),
    )(*args)
    return out[:, :in_channels]


# --------------------------------- params -----------------------------------

def init_params(key, in_channels, n_feat, n_classes):
    """Parameters laid out for the fused kernel (f32, zero-padded to 128 lanes)."""
    assert 4 * n_feat <= LANE, "each GCN / embed head must fit one 128-lane slot"
    assert in_channels <= LANE and n_classes <= LANE
    kit = iter(jax.random.split(key, 40))

    def wblk(i_real, o_real, rows, scale=0.1):
        w = jnp.zeros((rows, LANE), jnp.float32)
        return w.at[:i_real, :o_real].set(
            jax.random.normal(next(kit), (i_real, o_real), jnp.float32) * scale)

    def bblk(o_real, scale=0.01):
        b = jnp.zeros((1, LANE), jnp.float32)
        return b.at[0, :o_real].set(
            jax.random.normal(next(kit), (o_real,), jnp.float32) * scale)

    def pvec(o_real):
        v = jax.random.normal(next(kit), (o_real,), jnp.float32)
        v = v / jnp.linalg.norm(v)            # TopKPooling divides by ||p||
        return jnp.zeros((1, LANE), jnp.float32).at[0, :o_real].set(v)

    nf = n_feat
    w1 = wblk(in_channels, nf, rows=in_channels)                 # gcn1
    w_rest = jnp.stack([wblk(nf, 2 * nf, LANE),                  # gcn2
                        wblk(2 * nf, 4 * nf, LANE),              # gcn3
                        wblk(4 * nf, 2 * nf, LANE),              # gcn_up1
                        wblk(2 * nf, nf, LANE),                  # gcn_up2
                        wblk(nf, in_channels, LANE)])            # gcn_up3
    b_all = jnp.stack([bblk(nf), bblk(2 * nf), bblk(4 * nf),
                       bblk(2 * nf), bblk(nf), bblk(in_channels)])
    p_all = jnp.stack([pvec(nf), pvec(2 * nf), pvec(4 * nf)])

    # EmbedFC heads (contextembed0/1/2, timeembed0/1/2): first layers merged
    # along the lane axis, second layers as block-diagonal matrices.
    dims = (4 * nf, 2 * nf, nf)
    wc1 = jnp.zeros((LANE, 3 * LANE), jnp.float32)
    bc1 = jnp.zeros((1, 3 * LANE), jnp.float32)
    wc2 = jnp.zeros((3 * LANE, 3 * LANE), jnp.float32)
    bc2 = jnp.zeros((1, 3 * LANE), jnp.float32)
    wt1 = jnp.zeros((1, 3 * LANE), jnp.float32)
    bt1 = jnp.zeros((1, 3 * LANE), jnp.float32)
    wt2 = jnp.zeros((3 * LANE, 3 * LANE), jnp.float32)
    bt2 = jnp.zeros((1, 3 * LANE), jnp.float32)
    for i, d in enumerate(dims):
        lo = i * LANE
        wc1 = wc1.at[:n_classes, lo:lo + d].set(
            jax.random.normal(next(kit), (n_classes, d), jnp.float32) * 0.1)
        bc1 = bc1.at[0, lo:lo + d].set(
            jax.random.normal(next(kit), (d,), jnp.float32) * 0.01)
        wc2 = wc2.at[lo:lo + d, lo:lo + d].set(
            jax.random.normal(next(kit), (d, d), jnp.float32) * 0.1)
        bc2 = bc2.at[0, lo:lo + d].set(
            jax.random.normal(next(kit), (d,), jnp.float32) * 0.01)
        wt1 = wt1.at[0, lo:lo + d].set(
            jax.random.normal(next(kit), (d,), jnp.float32) * 0.1)
        bt1 = bt1.at[0, lo:lo + d].set(
            jax.random.normal(next(kit), (d,), jnp.float32) * 0.01)
        wt2 = wt2.at[lo:lo + d, lo:lo + d].set(
            jax.random.normal(next(kit), (d, d), jnp.float32) * 0.1)
        bt2 = bt2.at[0, lo:lo + d].set(
            jax.random.normal(next(kit), (d,), jnp.float32) * 0.01)

    # TODO(synk): self.out (Conv2d/GroupNorm head) is never called in the
    # reference forward, so it is not instantiated here.
    return {"w1": w1, "w": w_rest, "b": b_all, "p": p_all,
            "wc1": wc1, "bc1": bc1, "wc2": wc2, "bc2": bc2,
            "wt1": wt1, "bt1": bt1, "wt2": wt2, "bt2": bt2}


# ----------------------------------- main ------------------------------------

if __name__ == "__main__":
    key = jax.random.PRNGKey(0)
    B = 2
    N = 16            # number of graph nodes (x.shape[3])
    in_channels = N   # node features are eye(N), so GCN in_channels == N
    n_feat = 32
    n_classes = 10

    k_adj, k_c, k_t, k_mask, k_params = jax.random.split(key, 5)

    adj = (jax.random.uniform(k_adj, (B, 1, N, N)) < 0.3).astype(jnp.float32)
    adj = jnp.maximum(adj, jnp.transpose(adj, (0, 1, 3, 2)))   # undirected
    x = adj                                                    # [B, 1, N, N]
    c = jax.nn.one_hot(jax.random.randint(k_c, (B,), 0, n_classes),
                       n_classes, dtype=jnp.float32)           # [B, n_classes]
    t = jax.random.uniform(k_t, (B, 1), dtype=jnp.float32)     # [B, 1]
    context_mask = (jax.random.uniform(k_mask, (B,)) < 0.5).astype(jnp.float32)

    params = init_params(k_params, in_channels, n_feat, n_classes)

    out = gcn_context_unet_forward(params, x, c, t, context_mask,
                                   in_channels=in_channels)
    out = jax.block_until_ready(out)
    assert out.shape == (N, in_channels), out.shape
    assert bool(jnp.all(jnp.isfinite(out)))
    print("KERNEL_OK")
</pallas_src>

<mosaic_0001>
module attributes {stable_mosaic.version = 11 : i64} {
  func.func @_fused_unet_kernel(%arg0: memref<16x16xf32, #tpu.memory_space<vmem>>, %arg1: memref<16x128xf32, #tpu.memory_space<vmem>>, %arg2: memref<5x128x128xf32, #tpu.memory_space<vmem>>, %arg3: memref<6x1x128xf32, #tpu.memory_space<vmem>>, %arg4: memref<3x1x128xf32, #tpu.memory_space<vmem>>, %arg5: memref<1x128xf32, #tpu.memory_space<vmem>>, %arg6: memref<1x1xf32, #tpu.memory_space<vmem>>, %arg7: memref<128x384xf32, #tpu.memory_space<vmem>>, %arg8: memref<1x384xf32, #tpu.memory_space<vmem>>, %arg9: memref<384x384xf32, #tpu.memory_space<vmem>>, %arg10: memref<1x384xf32, #tpu.memory_space<vmem>>, %arg11: memref<1x384xf32, #tpu.memory_space<vmem>>, %arg12: memref<1x384xf32, #tpu.memory_space<vmem>>, %arg13: memref<384x384xf32, #tpu.memory_space<vmem>>, %arg14: memref<1x384xf32, #tpu.memory_space<vmem>>, %arg15: memref<16x128xf32, #tpu.memory_space<vmem>>) attributes {dimension_semantics = [], scalar_prefetch = 0 : i64, scratch_operands = 0 : i64, tpu.core_type = #tpu.core_type<tc>} {
    %c0 = arith.constant 0 : index
    %c0_0 = arith.constant 0 : index
    %0 = vector.load %arg0[%c0, %c0_0] : memref<16x16xf32, #tpu.memory_space<vmem>>, vector<16x16xf32>
    %1 = tpu.iota {dimensions = array<i32: 0>} : vector<16x16xi32>
    %2 = tpu.iota {dimensions = array<i32: 1>} : vector<16x16xi32>
    %3 = arith.cmpi eq, %1, %2 : vector<16x16xi32>
    %4 = arith.extui %3 : vector<16x16xi1> to vector<16x16xi32>
    %5 = arith.sitofp %4 : vector<16x16xi32> to vector<16x16xf32>
    %cst = arith.constant 1.000000e+00 : f32
    %6 = vector.broadcast %cst : f32 to vector<16x1xf32>
    %cst_1 = arith.constant dense<0.000000e+00> : vector<16xf32>
    %7 = vector.multi_reduction <add>, %0, %cst_1 [1] : vector<16x16xf32> to vector<16xf32>
    %8 = vector.shape_cast %7 : vector<16xf32> to vector<16x1xf32>
    %cst_2 = arith.constant 1.000000e+00 : f32
    %9 = vector.broadcast %cst_2 : f32 to vector<16x1xf32>
    %10 = arith.subf %9, %6 : vector<16x1xf32>
    %11 = arith.addf %8, %10 : vector<16x1xf32>
    %12 = math.rsqrt %11 : vector<16x1xf32>
    %c0_3 = arith.constant 0 : index
    %c0_4 = arith.constant 0 : index
    %13 = vector.load %arg1[%c0_3, %c0_4] : memref<16x128xf32, #tpu.memory_space<vmem>>, vector<16x128xf32>
    %14 = vector.broadcast %12 : vector<16x1xf32> to vector<16x128xf32>
    %15 = arith.mulf %13, %14 : vector<16x128xf32>
    %cst_5 = arith.constant dense<0.000000e+00> : vector<16x128xf32>
    %16 = tpu.matmul %0, %15, %cst_5 {dimension_numbers = #tpu.dot_dimension_numbers<[1], [0], [0], [1], [0, 0, 1, 1], [], []>} : vector<16x16xf32>, vector<16x128xf32>, vector<16x128xf32> -> vector<16x128xf32>
    %17 = vector.broadcast %12 : vector<16x1xf32> to vector<16x128xf32>
    %18 = arith.mulf %16, %17 : vector<16x128xf32>
    %c0_6 = arith.constant 0 : index
    %c0_7 = arith.constant 0 : index
    %c0_8 = arith.constant 0 : index
    %19 = vector.load %arg3[%c0_6, %c0_7, %c0_8] : memref<6x1x128xf32, #tpu.memory_space<vmem>>, vector<1x1x128xf32>
    %20 = vector.shape_cast %19 : vector<1x1x128xf32> to vector<1x128xf32>
    %21 = vector.broadcast %20 : vector<1x128xf32> to vector<16x128xf32>
    %22 = arith.addf %18, %21 : vector<16x128xf32>
    %c0_9 = arith.constant 0 : index
    %c0_10 = arith.constant 0 : index
    %c0_11 = arith.constant 0 : index
    %23 = vector.load %arg4[%c0_9, %c0_10, %c0_11] : memref<3x1x128xf32, #tpu.memory_space<vmem>>, vector<1x1x128xf32>
    %24 = vector.shape_cast %23 : vector<1x1x128xf32> to vector<1x128xf32>
    %25 = vector.broadcast %24 : vector<1x128xf32> to vector<16x128xf32>
    %26 = arith.mulf %22, %25 : vector<16x128xf32>
    %cst_12 = arith.constant dense<0.000000e+00> : vector<16xf32>
    %27 = vector.multi_reduction <add>, %26, %cst_12 [1] : vector<16x128xf32> to vector<16xf32>
    %28 = vector.shape_cast %27 : vector<16xf32> to vector<16x1xf32>
    %29 = math.tanh %28 : vector<16x1xf32>
    %cst_13 = arith.constant 0.000000e+00 : f32
    %30 = vector.broadcast %cst_13 : f32 to vector<16x1xf32>
    %31 = arith.cmpf ogt, %6, %30 : vector<16x1xf32>
    %cst_14 = arith.constant 0.000000e+00 : f32
    %cst_15 = arith.constant 1.000000e+30 : f32
    %32 = arith.subf %cst_14, %cst_15 : f32
    %33 = vector.broadcast %32 : f32 to vector<16x1xf32>
    %34 = arith.select %31, %28, %33 : vector<16x1xi1>, vector<16x1xf32>
    %35 = vector.broadcast %34 : vector<16x1xf32> to vector<16x16xf32>
    %36 = arith.mulf %5, %35 : vector<16x16xf32>
    %cst_16 = arith.constant dense<0.000000e+00> : vector<16xf32>
    %37 = vector.multi_reduction <add>, %36, %cst_16 [0] : vector<16x16xf32> to vector<16xf32>
    %38 = vector.shape_cast %37 : vector<16xf32> to vector<1x16xf32>
    %39 = vector.broadcast %38 : vector<1x16xf32> to vector<16x16xf32>
    %40 = vector.broadcast %34 : vector<16x1xf32> to vector<16x16xf32>
    %41 = arith.cmpf ogt, %39, %40 : vector<16x16xf32>
    %42 = vector.broadcast %38 : vector<1x16xf32> to vector<16x16xf32>
    %43 = vector.broadcast %34 : vector<16x1xf32> to vector<16x16xf32>
    %44 = arith.cmpf oeq, %42, %43 : vector<16x16xf32>
    %45 = arith.cmpi slt, %2, %1 : vector<16x16xi32>
    %46 = arith.andi %44, %45 : vector<16x16xi1>
    %47 = arith.ori %41, %46 : vector<16x16xi1>
    %48 = arith.extui %47 : vector<16x16xi1> to vector<16x16xi32>
    %49 = arith.sitofp %48 : vector<16x16xi32> to vector<16x16xf32>
    %cst_17 = arith.constant dense<0.000000e+00> : vector<16xf32>
    %50 = vector.multi_reduction <add>, %49, %cst_17 [1] : vector<16x16xf32> to vector<16xf32>
    %51 = vector.shape_cast %50 : vector<16xf32> to vector<16x1xf32>
    %cst_18 = arith.constant 8.000000e+00 : f32
    %52 = vector.broadcast %cst_18 : f32 to vector<16x1xf32>
    %53 = arith.cmpf olt, %51, %52 : vector<16x1xf32>
    %54 = arith.extui %53 : vector<16x1xi1> to vector<16x1xi32>
    %55 = arith.sitofp %54 : vector<16x1xi32> to vector<16x1xf32>
    %56 = arith.mulf %55, %29 : vector<16x1xf32>
    %57 = vector.broadcast %56 : vector<16x1xf32> to vector<16x128xf32>
    %58 = arith.mulf %57, %22 : vector<16x128xf32>
    %59 = vector.broadcast %55 : vector<16x1xf32> to vector<16x16xf32>
    %60 = arith.mulf %0, %59 : vector<16x16xf32>
    %61 = vector.broadcast %55 : vector<16x1xf32> to vector<16x16xf32>
    %62 = arith.mulf %5, %61 : vector<16x16xf32>
    %cst_19 = arith.constant dense<0.000000e+00> : vector<16xf32>
    %63 = vector.multi_reduction <add>, %62, %cst_19 [0] : vector<16x16xf32> to vector<16xf32>
    %64 = vector.shape_cast %63 : vector<16xf32> to vector<1x16xf32>
    %65 = vector.broadcast %64 : vector<1x16xf32> to vector<16x16xf32>
    %66 = arith.mulf %60, %65 : vector<16x16xf32>
    %cst_20 = arith.constant dense<0.000000e+00> : vector<16xf32>
    %67 = vector.multi_reduction <add>, %66, %cst_20 [1] : vector<16x16xf32> to vector<16xf32>
    %68 = vector.shape_cast %67 : vector<16xf32> to vector<16x1xf32>
    %cst_21 = arith.constant 1.000000e+00 : f32
    %69 = vector.broadcast %cst_21 : f32 to vector<16x1xf32>
    %70 = arith.subf %69, %55 : vector<16x1xf32>
    %71 = arith.addf %68, %70 : vector<16x1xf32>
    %72 = math.rsqrt %71 : vector<16x1xf32>
    %c0_22 = arith.constant 0 : index
    %c0_23 = arith.constant 0 : index
    %c0_24 = arith.constant 0 : index
    %73 = vector.load %arg2[%c0_22, %c0_23, %c0_24] : memref<5x128x128xf32, #tpu.memory_space<vmem>>, vector<1x128x128xf32>
    %74 = vector.shape_cast %73 : vector<1x128x128xf32> to vector<128x128xf32>
    %cst_25 = arith.constant dense<0.000000e+00> : vector<16x128xf32>
    %75 = tpu.matmul %58, %74, %cst_25 {dimension_numbers = #tpu.dot_dimension_numbers<[1], [0], [0], [1], [0, 0, 1, 1], [], []>} : vector<16x128xf32>, vector<128x128xf32>, vector<16x128xf32> -> vector<16x128xf32>
    %76 = vector.broadcast %72 : vector<16x1xf32> to vector<16x128xf32>
    %77 = arith.mulf %75, %76 : vector<16x128xf32>
    %cst_26 = arith.constant dense<0.000000e+00> : vector<16x128xf32>
    %78 = tpu.matmul %66, %77, %cst_26 {dimension_numbers = #tpu.dot_dimension_numbers<[1], [0], [0], [1], [0, 0, 1, 1], [], []>} : vector<16x16xf32>, vector<16x128xf32>, vector<16x128xf32> -> vector<16x128xf32>
    %79 = vector.broadcast %72 : vector<16x1xf32> to vector<16x128xf32>
    %80 = arith.mulf %78, %79 : vector<16x128xf32>
    %c1 = arith.constant 1 : index
    %c0_27 = arith.constant 0 : index
    %c0_28 = arith.constant 0 : index
    %81 = vector.load %arg3[%c1, %c0_27, %c0_28] : memref<6x1x128xf32, #tpu.memory_space<vmem>>, vector<1x1x128xf32>
    %82 = vector.shape_cast %81 : vector<1x1x128xf32> to vector<1x128xf32>
    %83 = vector.broadcast %82 : vector<1x128xf32> to vector<16x128xf32>
    %84 = arith.addf %80, %83 : vector<16x128xf32>
    %85 = vector.broadcast %55 : vector<16x1xf32> to vector<16x128xf32>
    %86 = arith.mulf %85, %84 : vector<16x128xf32>
    %c1_29 = arith.constant 1 : index
    %c0_30 = arith.constant 0 : index
    %c0_31 = arith.constant 0 : index
    %87 = vector.load %arg4[%c1_29, %c0_30, %c0_31] : memref<3x1x128xf32, #tpu.memory_space<vmem>>, vector<1x1x128xf32>
    %88 = vector.shape_cast %87 : vector<1x1x128xf32> to vector<1x128xf32>
    %89 = vector.broadcast %88 : vector<1x128xf32> to vector<16x128xf32>
    %90 = arith.mulf %86, %89 : vector<16x128xf32>
    %cst_32 = arith.constant dense<0.000000e+00> : vector<16xf32>
    %91 = vector.multi_reduction <add>, %90, %cst_32 [1] : vector<16x128xf32> to vector<16xf32>
    %92 = vector.shape_cast %91 : vector<16xf32> to vector<16x1xf32>
    %93 = math.tanh %92 : vector<16x1xf32>
    %cst_33 = arith.constant 0.000000e+00 : f32
    %94 = vector.broadcast %cst_33 : f32 to vector<16x1xf32>
    %95 = arith.cmpf ogt, %55, %94 : vector<16x1xf32>
    %cst_34 = arith.constant 0.000000e+00 : f32
    %cst_35 = arith.constant 1.000000e+30 : f32
    %96 = arith.subf %cst_34, %cst_35 : f32
    %97 = vector.broadcast %96 : f32 to vector<16x1xf32>
    %98 = arith.select %95, %92, %97 : vector<16x1xi1>, vector<16x1xf32>
    %99 = vector.broadcast %98 : vector<16x1xf32> to vector<16x16xf32>
    %100 = arith.mulf %5, %99 : vector<16x16xf32>
    %cst_36 = arith.constant dense<0.000000e+00> : vector<16xf32>
    %101 = vector.multi_reduction <add>, %100, %cst_36 [0] : vector<16x16xf32> to vector<16xf32>
    %102 = vector.shape_cast %101 : vector<16xf32> to vector<1x16xf32>
    %103 = vector.broadcast %102 : vector<1x16xf32> to vector<16x16xf32>
    %104 = vector.broadcast %98 : vector<16x1xf32> to vector<16x16xf32>
    %105 = arith.cmpf ogt, %103, %104 : vector<16x16xf32>
    %106 = vector.broadcast %102 : vector<1x16xf32> to vector<16x16xf32>
    %107 = vector.broadcast %98 : vector<16x1xf32> to vector<16x16xf32>
    %108 = arith.cmpf oeq, %106, %107 : vector<16x16xf32>
    %109 = arith.cmpi slt, %2, %1 : vector<16x16xi32>
    %110 = arith.andi %108, %109 : vector<16x16xi1>
    %111 = arith.ori %105, %110 : vector<16x16xi1>
    %112 = arith.extui %111 : vector<16x16xi1> to vector<16x16xi32>
    %113 = arith.sitofp %112 : vector<16x16xi32> to vector<16x16xf32>
    %cst_37 = arith.constant dense<0.000000e+00> : vector<16xf32>
    %114 = vector.multi_reduction <add>, %113, %cst_37 [1] : vector<16x16xf32> to vector<16xf32>
    %115 = vector.shape_cast %114 : vector<16xf32> to vector<16x1xf32>
    %cst_38 = arith.constant 4.000000e+00 : f32
    %116 = vector.broadcast %cst_38 : f32 to vector<16x1xf32>
    %117 = arith.cmpf olt, %115, %116 : vector<16x1xf32>
    %118 = arith.extui %117 : vector<16x1xi1> to vector<16x1xi32>
    %119 = arith.sitofp %118 : vector<16x1xi32> to vector<16x1xf32>
    %120 = arith.mulf %119, %93 : vector<16x1xf32>
    %121 = vector.broadcast %120 : vector<16x1xf32> to vector<16x128xf32>
    %122 = arith.mulf %121, %86 : vector<16x128xf32>
    %123 = vector.broadcast %119 : vector<16x1xf32> to vector<16x16xf32>
    %124 = arith.mulf %0, %123 : vector<16x16xf32>
    %125 = vector.broadcast %119 : vector<16x1xf32> to vector<16x16xf32>
    %126 = arith.mulf %5, %125 : vector<16x16xf32>
    %cst_39 = arith.constant dense<0.000000e+00> : vector<16xf32>
    %127 = vector.multi_reduction <add>, %126, %cst_39 [0] : vector<16x16xf32> to vector<16xf32>
    %128 = vector.shape_cast %127 : vector<16xf32> to vector<1x16xf32>
    %129 = vector.broadcast %128 : vector<1x16xf32> to vector<16x16xf32>
    %130 = arith.mulf %124, %129 : vector<16x16xf32>
    %cst_40 = arith.constant dense<0.000000e+00> : vector<16xf32>
    %131 = vector.multi_reduction <add>, %130, %cst_40 [1] : vector<16x16xf32> to vector<16xf32>
    %132 = vector.shape_cast %131 : vector<16xf32> to vector<16x1xf32>
    %cst_41 = arith.constant 1.000000e+00 : f32
    %133 = vector.broadcast %cst_41 : f32 to vector<16x1xf32>
    %134 = arith.subf %133, %119 : vector<16x1xf32>
    %135 = arith.addf %132, %134 : vector<16x1xf32>
    %136 = math.rsqrt %135 : vector<16x1xf32>
    %c1_42 = arith.constant 1 : index
    %c0_43 = arith.constant 0 : index
    %c0_44 = arith.constant 0 : index
    %137 = vector.load %arg2[%c1_42, %c0_43, %c0_44] : memref<5x128x128xf32, #tpu.memory_space<vmem>>, vector<1x128x128xf32>
    %138 = vector.shape_cast %137 : vector<1x128x128xf32> to vector<128x128xf32>
    %cst_45 = arith.constant dense<0.000000e+00> : vector<16x128xf32>
    %139 = tpu.matmul %122, %138, %cst_45 {dimension_numbers = #tpu.dot_dimension_numbers<[1], [0], [0], [1], [0, 0, 1, 1], [], []>} : vector<16x128xf32>, vector<128x128xf32>, vector<16x128xf32> -> vector<16x128xf32>
    %140 = vector.broadcast %136 : vector<16x1xf32> to vector<16x128xf32>
    %141 = arith.mulf %139, %140 : vector<16x128xf32>
    %cst_46 = arith.constant dense<0.000000e+00> : vector<16x128xf32>
    %142 = tpu.matmul %130, %141, %cst_46 {dimension_numbers = #tpu.dot_dimension_numbers<[1], [0], [0], [1], [0, 0, 1, 1], [], []>} : vector<16x16xf32>, vector<16x128xf32>, vector<16x128xf32> -> vector<16x128xf32>
    %143 = vector.broadcast %136 : vector<16x1xf32> to vector<16x128xf32>
    %144 = arith.mulf %142, %143 : vector<16x128xf32>
    %c2 = arith.constant 2 : index
    %c0_47 = arith.constant 0 : index
    %c0_48 = arith.constant 0 : index
    %145 = vector.load %arg3[%c2, %c0_47, %c0_48] : memref<6x1x128xf32, #tpu.memory_space<vmem>>, vector<1x1x128xf32>
    %146 = vector.shape_cast %145 : vector<1x1x128xf32> to vector<1x128xf32>
    %147 = vector.broadcast %146 : vector<1x128xf32> to vector<16x128xf32>
    %148 = arith.addf %144, %147 : vector<16x128xf32>
    %149 = vector.broadcast %119 : vector<16x1xf32> to vector<16x128xf32>
    %150 = arith.mulf %149, %148 : vector<16x128xf32>
    %c2_49 = arith.constant 2 : index
    %c0_50 = arith.constant 0 : index
    %c0_51 = arith.constant 0 : index
    %151 = vector.load %arg4[%c2_49, %c0_50, %c0_51] : memref<3x1x128xf32, #tpu.memory_space<vmem>>, vector<1x1x128xf32>
    %152 = vector.shape_cast %151 : vector<1x1x128xf32> to vector<1x128xf32>
    %153 = vector.broadcast %152 : vector<1x128xf32> to vector<16x128xf32>
    %154 = arith.mulf %150, %153 : vector<16x128xf32>
    %cst_52 = arith.constant dense<0.000000e+00> : vector<16xf32>
    %155 = vector.multi_reduction <add>, %154, %cst_52 [1] : vector<16x128xf32> to vector<16xf32>
    %156 = vector.shape_cast %155 : vector<16xf32> to vector<16x1xf32>
    %157 = math.tanh %156 : vector<16x1xf32>
    %cst_53 = arith.constant 0.000000e+00 : f32
    %158 = vector.broadcast %cst_53 : f32 to vector<16x1xf32>
    %159 = arith.cmpf ogt, %119, %158 : vector<16x1xf32>
    %cst_54 = arith.constant 0.000000e+00 : f32
    %cst_55 = arith.constant 1.000000e+30 : f32
    %160 = arith.subf %cst_54, %cst_55 : f32
    %161 = vector.broadcast %160 : f32 to vector<16x1xf32>
    %162 = arith.select %159, %156, %161 : vector<16x1xi1>, vector<16x1xf32>
    %163 = vector.broadcast %162 : vector<16x1xf32> to vector<16x16xf32>
    %164 = arith.mulf %5, %163 : vector<16x16xf32>
    %cst_56 = arith.constant dense<0.000000e+00> : vector<16xf32>
    %165 = vector.multi_reduction <add>, %164, %cst_56 [0] : vector<16x16xf32> to vector<16xf32>
    %166 = vector.shape_cast %165 : vector<16xf32> to vector<1x16xf32>
    %167 = vector.broadcast %166 : vector<1x16xf32> to vector<16x16xf32>
    %168 = vector.broadcast %162 : vector<16x1xf32> to vector<16x16xf32>
    %169 = arith.cmpf ogt, %167, %168 : vector<16x16xf32>
    %170 = vector.broadcast %166 : vector<1x16xf32> to vector<16x16xf32>
    %171 = vector.broadcast %162 : vector<16x1xf32> to vector<16x16xf32>
    %172 = arith.cmpf oeq, %170, %171 : vector<16x16xf32>
    %173 = arith.cmpi slt, %2, %1 : vector<16x16xi32>
    %174 = arith.andi %172, %173 : vector<16x16xi1>
    %175 = arith.ori %169, %174 : vector<16x16xi1>
    %176 = arith.extui %175 : vector<16x16xi1> to vector<16x16xi32>
    %177 = arith.sitofp %176 : vector<16x16xi32> to vector<16x16xf32>
    %cst_57 = arith.constant dense<0.000000e+00> : vector<16xf32>
    %178 = vector.multi_reduction <add>, %177, %cst_57 [1] : vector<16x16xf32> to vector<16xf32>
    %179 = vector.shape_cast %178 : vector<16xf32> to vector<16x1xf32>
    %cst_58 = arith.constant 1.000000e+00 : f32
    %180 = vector.broadcast %cst_58 : f32 to vector<16x1xf32>
    %181 = arith.cmpf olt, %179, %180 : vector<16x1xf32>
    %182 = arith.extui %181 : vector<16x1xi1> to vector<16x1xi32>
    %183 = arith.sitofp %182 : vector<16x1xi32> to vector<16x1xf32>
    %184 = arith.mulf %183, %157 : vector<16x1xf32>
    %185 = vector.broadcast %184 : vector<16x1xf32> to vector<16x128xf32>
    %186 = arith.mulf %185, %150 : vector<16x128xf32>
    %c0_59 = arith.constant 0 : index
    %c0_60 = arith.constant 0 : index
    %187 = vector.load %arg5[%c0_59, %c0_60] : memref<1x128xf32, #tpu.memory_space<vmem>>, vector<1x128xf32>
    %c0_61 = arith.constant 0 : index
    %c0_62 = arith.constant 0 : index
    %188 = vector.load %arg7[%c0_61, %c0_62] : memref<128x384xf32, #tpu.memory_space<vmem>>, vector<128x384xf32>
    %cst_63 = arith.constant dense<0.000000e+00> : vector<1x384xf32>
    %189 = tpu.matmul %187, %188, %cst_63 {dimension_numbers = #tpu.dot_dimension_numbers<[1], [0], [0], [1], [0, 0, 1, 1], [], []>} : vector<1x128xf32>, vector<128x384xf32>, vector<1x384xf32> -> vector<1x384xf32>
    %c0_64 = arith.constant 0 : index
    %c0_65 = arith.constant 0 : index
    %190 = vector.load %arg8[%c0_64, %c0_65] : memref<1x384xf32, #tpu.memory_space<vmem>>, vector<1x384xf32>
    %191 = arith.addf %189, %190 : vector<1x384xf32>
    %cst_66 = arith.constant 5.000000e-01 : f32
    %192 = vector.broadcast %cst_66 : f32 to vector<1x384xf32>
    %193 = arith.mulf %192, %191 : vector<1x384xf32>
    %cst_67 = arith.constant 4.471500e-02 : f32
    %194 = vector.broadcast %cst_67 : f32 to vector<1x384xf32>
    %195 = arith.mulf %194, %191 : vector<1x384xf32>
    %196 = arith.mulf %195, %191 : vector<1x384xf32>
    %197 = arith.mulf %196, %191 : vector<1x384xf32>
    %198 = arith.addf %191, %197 : vector<1x384xf32>
    %cst_68 = arith.constant 0.797884583 : f32
    %199 = vector.broadcast %cst_68 : f32 to vector<1x384xf32>
    %200 = arith.mulf %199, %198 : vector<1x384xf32>
    %201 = math.tanh %200 : vector<1x384xf32>
    %cst_69 = arith.constant 1.000000e+00 : f32
    %202 = vector.broadcast %cst_69 : f32 to vector<1x384xf32>
    %203 = arith.addf %202, %201 : vector<1x384xf32>
    %204 = arith.mulf %193, %203 : vector<1x384xf32>
    %c0_70 = arith.constant 0 : index
    %c0_71 = arith.constant 0 : index
    %205 = vector.load %arg9[%c0_70, %c0_71] : memref<384x384xf32, #tpu.memory_space<vmem>>, vector<384x384xf32>
    %cst_72 = arith.constant dense<0.000000e+00> : vector<1x384xf32>
    %206 = tpu.matmul %204, %205, %cst_72 {dimension_numbers = #tpu.dot_dimension_numbers<[1], [0], [0], [1], [0, 0, 1, 1], [], []>} : vector<1x384xf32>, vector<384x384xf32>, vector<1x384xf32> -> vector<1x384xf32>
    %c0_73 = arith.constant 0 : index
    %c0_74 = arith.constant 0 : index
    %207 = vector.load %arg10[%c0_73, %c0_74] : memref<1x384xf32, #tpu.memory_space<vmem>>, vector<1x384xf32>
    %208 = arith.addf %206, %207 : vector<1x384xf32>
    %c0_75 = arith.constant 0 : index
    %c0_76 = arith.constant 0 : index
    %209 = vector.load %arg6[%c0_75, %c0_76] : memref<1x1xf32, #tpu.memory_space<vmem>>, vector<1x1xf32>
    %c0_77 = arith.constant 0 : index
    %c0_78 = arith.constant 0 : index
    %210 = vector.load %arg11[%c0_77, %c0_78] : memref<1x384xf32, #tpu.memory_space<vmem>>, vector<1x384xf32>
    %211 = vector.broadcast %209 : vector<1x1xf32> to vector<1x384xf32>
    %212 = arith.mulf %211, %210 : vector<1x384xf32>
    %c0_79 = arith.constant 0 : index
    %c0_80 = arith.constant 0 : index
    %213 = vector.load %arg12[%c0_79, %c0_80] : memref<1x384xf32, #tpu.memory_space<vmem>>, vector<1x384xf32>
    %214 = arith.addf %212, %213 : vector<1x384xf32>
    %cst_81 = arith.constant 5.000000e-01 : f32
    %215 = vector.broadcast %cst_81 : f32 to vector<1x384xf32>
    %216 = arith.mulf %215, %214 : vector<1x384xf32>
    %cst_82 = arith.constant 4.471500e-02 : f32
    %217 = vector.broadcast %cst_82 : f32 to vector<1x384xf32>
    %218 = arith.mulf %217, %214 : vector<1x384xf32>
    %219 = arith.mulf %218, %214 : vector<1x384xf32>
    %220 = arith.mulf %219, %214 : vector<1x384xf32>
    %221 = arith.addf %214, %220 : vector<1x384xf32>
    %cst_83 = arith.constant 0.797884583 : f32
    %222 = vector.broadcast %cst_83 : f32 to vector<1x384xf32>
    %223 = arith.mulf %222, %221 : vector<1x384xf32>
    %224 = math.tanh %223 : vector<1x384xf32>
    %cst_84 = arith.constant 1.000000e+00 : f32
    %225 = vector.broadcast %cst_84 : f32 to vector<1x384xf32>
    %226 = arith.addf %225, %224 : vector<1x384xf32>
    %227 = arith.mulf %216, %226 : vector<1x384xf32>
    %c0_85 = arith.constant 0 : index
    %c0_86 = arith.constant 0 : index
    %228 = vector.load %arg13[%c0_85, %c0_86] : memref<384x384xf32, #tpu.memory_space<vmem>>, vector<384x384xf32>
    %cst_87 = arith.constant dense<0.000000e+00> : vector<1x384xf32>
    %229 = tpu.matmul %227, %228, %cst_87 {dimension_numbers = #tpu.dot_dimension_numbers<[1], [0], [0], [1], [0, 0, 1, 1], [], []>} : vector<1x384xf32>, vector<384x384xf32>, vector<1x384xf32> -> vector<1x384xf32>
    %c0_88 = arith.constant 0 : index
    %c0_89 = arith.constant 0 : index
    %230 = vector.load %arg14[%c0_88, %c0_89] : memref<1x384xf32, #tpu.memory_space<vmem>>, vector<1x384xf32>
    %231 = arith.addf %229, %230 : vector<1x384xf32>
    %232 = vector.extract_strided_slice %208 {offsets = [0, 0], sizes = [1, 128], strides = [1, 1]} : vector<1x384xf32> to vector<1x128xf32>
    %233 = vector.extract_strided_slice %208 {offsets = [0, 128], sizes = [1, 128], strides = [1, 1]} : vector<1x384xf32> to vector<1x128xf32>
    %234 = vector.extract_strided_slice %208 {offsets = [0, 256], sizes = [1, 128], strides = [1, 1]} : vector<1x384xf32> to vector<1x128xf32>
    %235 = vector.extract_strided_slice %231 {offsets = [0, 0], sizes = [1, 128], strides = [1, 1]} : vector<1x384xf32> to vector<1x128xf32>
    %236 = vector.extract_strided_slice %231 {offsets = [0, 128], sizes = [1, 128], strides = [1, 1]} : vector<1x384xf32> to vector<1x128xf32>
    %237 = vector.extract_strided_slice %231 {offsets = [0, 256], sizes = [1, 128], strides = [1, 1]} : vector<1x384xf32> to vector<1x128xf32>
    %238 = vector.broadcast %232 : vector<1x128xf32> to vector<16x128xf32>
    %239 = arith.mulf %186, %238 : vector<16x128xf32>
    %240 = vector.broadcast %183 : vector<16x1xf32> to vector<16x128xf32>
    %241 = vector.broadcast %235 : vector<1x128xf32> to vector<16x128xf32>
    %242 = arith.mulf %240, %241 : vector<16x128xf32>
    %243 = arith.addf %239, %242 : vector<16x128xf32>
    %c2_90 = arith.constant 2 : index
    %c0_91 = arith.constant 0 : index
    %c0_92 = arith.constant 0 : index
    %244 = vector.load %arg2[%c2_90, %c0_91, %c0_92] : memref<5x128x128xf32, #tpu.memory_space<vmem>>, vector<1x128x128xf32>
    %245 = vector.shape_cast %244 : vector<1x128x128xf32> to vector<128x128xf32>
    %cst_93 = arith.constant dense<0.000000e+00> : vector<16x128xf32>
    %246 = tpu.matmul %243, %245, %cst_93 {dimension_numbers = #tpu.dot_dimension_numbers<[1], [0], [0], [1], [0, 0, 1, 1], [], []>} : vector<16x128xf32>, vector<128x128xf32>, vector<16x128xf32> -> vector<16x128xf32>
    %247 = vector.broadcast %136 : vector<16x1xf32> to vector<16x128xf32>
    %248 = arith.mulf %246, %247 : vector<16x128xf32>
    %cst_94 = arith.constant dense<0.000000e+00> : vector<16x128xf32>
    %249 = tpu.matmul %130, %248, %cst_94 {dimension_numbers = #tpu.dot_dimension_numbers<[1], [0], [0], [1], [0, 0, 1, 1], [], []>} : vector<16x16xf32>, vector<16x128xf32>, vector<16x128xf32> -> vector<16x128xf32>
    %250 = vector.broadcast %136 : vector<16x1xf32> to vector<16x128xf32>
    %251 = arith.mulf %249, %250 : vector<16x128xf32>
    %c3 = arith.constant 3 : index
    %c0_95 = arith.constant 0 : index
    %c0_96 = arith.constant 0 : index
    %252 = vector.load %arg3[%c3, %c0_95, %c0_96] : memref<6x1x128xf32, #tpu.memory_space<vmem>>, vector<1x1x128xf32>
    %253 = vector.shape_cast %252 : vector<1x1x128xf32> to vector<1x128xf32>
    %254 = vector.broadcast %253 : vector<1x128xf32> to vector<16x128xf32>
    %255 = arith.addf %251, %254 : vector<16x128xf32>
    %256 = vector.broadcast %119 : vector<16x1xf32> to vector<16x128xf32>
    %257 = arith.mulf %256, %255 : vector<16x128xf32>
    %258 = vector.broadcast %233 : vector<1x128xf32> to vector<16x128xf32>
    %259 = arith.mulf %257, %258 : vector<16x128xf32>
    %260 = vector.broadcast %119 : vector<16x1xf32> to vector<16x128xf32>
    %261 = vector.broadcast %236 : vector<1x128xf32> to vector<16x128xf32>
    %262 = arith.mulf %260, %261 : vector<16x128xf32>
    %263 = arith.addf %259, %262 : vector<16x128xf32>
    %c3_97 = arith.constant 3 : index
    %c0_98 = arith.constant 0 : index
    %c0_99 = arith.constant 0 : index
    %264 = vector.load %arg2[%c3_97, %c0_98, %c0_99] : memref<5x128x128xf32, #tpu.memory_space<vmem>>, vector<1x128x128xf32>
    %265 = vector.shape_cast %264 : vector<1x128x128xf32> to vector<128x128xf32>
    %cst_100 = arith.constant dense<0.000000e+00> : vector<16x128xf32>
    %266 = tpu.matmul %263, %265, %cst_100 {dimension_numbers = #tpu.dot_dimension_numbers<[1], [0], [0], [1], [0, 0, 1, 1], [], []>} : vector<16x128xf32>, vector<128x128xf32>, vector<16x128xf32> -> vector<16x128xf32>
    %267 = vector.broadcast %72 : vector<16x1xf32> to vector<16x128xf32>
    %268 = arith.mulf %266, %267 : vector<16x128xf32>
    %cst_101 = arith.constant dense<0.000000e+00> : vector<16x128xf32>
    %269 = tpu.matmul %66, %268, %cst_101 {dimension_numbers = #tpu.dot_dimension_numbers<[1], [0], [0], [1], [0, 0, 1, 1], [], []>} : vector<16x16xf32>, vector<16x128xf32>, vector<16x128xf32> -> vector<16x128xf32>
    %270 = vector.broadcast %72 : vector<16x1xf32> to vector<16x128xf32>
    %271 = arith.mulf %269, %270 : vector<16x128xf32>
    %c4 = arith.constant 4 : index
    %c0_102 = arith.constant 0 : index
    %c0_103 = arith.constant 0 : index
    %272 = vector.load %arg3[%c4, %c0_102, %c0_103] : memref<6x1x128xf32, #tpu.memory_space<vmem>>, vector<1x1x128xf32>
    %273 = vector.shape_cast %272 : vector<1x1x128xf32> to vector<1x128xf32>
    %274 = vector.broadcast %273 : vector<1x128xf32> to vector<16x128xf32>
    %275 = arith.addf %271, %274 : vector<16x128xf32>
    %276 = vector.broadcast %55 : vector<16x1xf32> to vector<16x128xf32>
    %277 = arith.mulf %276, %275 : vector<16x128xf32>
    %278 = vector.broadcast %234 : vector<1x128xf32> to vector<16x128xf32>
    %279 = arith.mulf %277, %278 : vector<16x128xf32>
    %280 = vector.broadcast %55 : vector<16x1xf32> to vector<16x128xf32>
    %281 = vector.broadcast %237 : vector<1x128xf32> to vector<16x128xf32>
    %282 = arith.mulf %280, %281 : vector<16x128xf32>
    %283 = arith.addf %279, %282 : vector<16x128xf32>
    %c4_104 = arith.constant 4 : index
    %c0_105 = arith.constant 0 : index
    %c0_106 = arith.constant 0 : index
    %284 = vector.load %arg2[%c4_104, %c0_105, %c0_106] : memref<5x128x128xf32, #tpu.memory_space<vmem>>, vector<1x128x128xf32>
    %285 = vector.shape_cast %284 : vector<1x128x128xf32> to vector<128x128xf32>
    %cst_107 = arith.constant dense<0.000000e+00> : vector<16x128xf32>
    %286 = tpu.matmul %283, %285, %cst_107 {dimension_numbers = #tpu.dot_dimension_numbers<[1], [0], [0], [1], [0, 0, 1, 1], [], []>} : vector<16x128xf32>, vector<128x128xf32>, vector<16x128xf32> -> vector<16x128xf32>
    %287 = vector.broadcast %12 : vector<16x1xf32> to vector<16x128xf32>
    %288 = arith.mulf %286, %287 : vector<16x128xf32>
    %cst_108 = arith.constant dense<0.000000e+00> : vector<16x128xf32>
    %289 = tpu.matmul %0, %288, %cst_108 {dimension_numbers = #tpu.dot_dimension_numbers<[1], [0], [0], [1], [0, 0, 1, 1], [], []>} : vector<16x16xf32>, vector<16x128xf32>, vector<16x128xf32> -> vector<16x128xf32>
    %290 = vector.broadcast %12 : vector<16x1xf32> to vector<16x128xf32>
    %291 = arith.mulf %289, %290 : vector<16x128xf32>
    %c5 = arith.constant 5 : index
    %c0_109 = arith.constant 0 : index
    %c0_110 = arith.constant 0 : index
    %292 = vector.load %arg3[%c5, %c0_109, %c0_110] : memref<6x1x128xf32, #tpu.memory_space<vmem>>, vector<1x1x128xf32>
    %293 = vector.shape_cast %292 : vector<1x1x128xf32> to vector<1x128xf32>
    %294 = vector.broadcast %293 : vector<1x128xf32> to vector<16x128xf32>
    %295 = arith.addf %291, %294 : vector<16x128xf32>
    %c0_111 = arith.constant 0 : index
    %c0_112 = arith.constant 0 : index
    %296 = vector.load %arg15[%c0_111, %c0_112] : memref<16x128xf32, #tpu.memory_space<vmem>>, vector<16x128xf32>
    tpu.vector_store %arg15[%c0_111, %c0_112], %295 {strides = array<i32>} : memref<16x128xf32, #tpu.memory_space<vmem>>, vector<16x128xf32>,
    return
  }
}

</mosaic_0001>

<bundles_post_ra>
// kernel: gcn_context_unet_forward.1
= control target key start
LH: loop header
LB: loop body
LE: loop exit
PB: predicated region body
PF: predicated region fallthrough
CT: control target
= control target key end

     0   :  { %s2453_s0 = inlined_call_operand.vmem [shape: f32[16,16], index: 0, kind: input, shape index: {}]   ;;  %s2454_s1 = inlined_call_operand.vmem [shape: f32[16,128], index: 1, kind: input, shape index: {}]   ;;  %s2455_s2 = inlined_call_operand.hbm [shape: f32[5,128,128], index: 2, kind: input, shape index: {}]   ;;  %s2456_s3 = inlined_call_operand.vmem [shape: f32[6,1,128], index: 3, kind: input, shape index: {}]   ;;  %s2457_s4 = inlined_call_operand.vmem [shape: f32[3,1,128], index: 4, kind: input, shape index: {}]   ;;  %s2458_s5 = inlined_call_operand.vmem [shape: f32[1,128], index: 5, kind: input, shape index: {}]   ;;  %s2459_s6 = inlined_call_operand.<no memory space> [shape: f32[1,1], index: 6, kind: input, shape index: {}]   ;;  %s2460_s7 = inlined_call_operand.hbm [shape: f32[128,384], index: 7, kind: input, shape index: {}]   ;;  %s2461_s8 = inlined_call_operand.vmem [shape: f32[1,384], index: 8, kind: input, shape index: {}]   ;;  %s2462_s9 = inlined_call_operand.hbm [shape: f32[384,384], index: 9, kind: input, shape index: {}]   ;;  %s2463_s10 = inlined_call_operand.vmem [shape: f32[1,384], index: 10, kind: input, shape index: {}]   ;;  %s2464_s11 = inlined_call_operand.vmem [shape: f32[1,384], index: 11, kind: input, shape index: {}]   ;;  %s2465_s12 = inlined_call_operand.vmem [shape: f32[1,384], index: 12, kind: input, shape index: {}]   ;;  %s2466_s13 = inlined_call_operand.hbm [shape: f32[384,384], index: 13, kind: input, shape index: {}]   ;;  %s2467_s14 = inlined_call_operand.vmem [shape: f32[1,384], index: 14, kind: input, shape index: {}]   ;;  %s2468_s15 = inlined_call_operand.hbm [shape: f32[16,128], index: 15, kind: output, shape index: {}]  }
   0x1   :  { %v20_v0 = vstv %s2459_s6 }
   0x2   :  { %21 = vst [vmem:[#allocation2] sm:$0x1] %v20_v0 }
   0x3   :  { %22 = vsyncpa [#allocation4], 0 }
   0x4   :  { %23 = vsyncpa [#allocation7], 0 }
   0x5   :  { %24 = vsyncpa [#allocation10], 0  ;;  %s55_s22 = sshll.u32 %s2460_s7, 4  ;;  %s56_s22 = int_to_ptr.hbm [resolvable:$true] %s55_s22 }
   0x6   :  { %25 = vsyncpa [#allocation5], 0  ;;  %s1945_s23 = smov [#allocation6]   ;;  %s34_s27 = sshll.u32 %s2455_s2, 4  ;;  %s35_s27 = int_to_ptr.hbm [resolvable:$true] %s34_s27 }
   0x7   :  { %s57_s24 = sshll.u32 %s1945_s23, 4  ;;  %s1946_s28 = smov 384   ;;  %s58_s24 = int_to_ptr.vmem [resolvable:$true] %s57_s24 }
   0x8   :  { %s1947_s29 = smov 24   ;;  %s1948_s6 = smov [#allocation3]  }
   0x9   :  { %63 = dma.hbm_to_vmem [thread:$0]  %s56_s22, 6144, %s58_s24, [#allocation7], %s1946_s28, %s1946_s28, %s1947_s29  }
   0xa   :  { %s36_s30 = sshll.u32 %s1948_s6, 4  ;;  %s1949_s16 = smov 128   ;;  %s37_s30 = int_to_ptr.vmem [resolvable:$true] %s36_s30 }
   0xb   :  { %s1950_s17 = smov 8   ;;  %s70_s19 = sshll.u32 %s2462_s9, 4  ;;  %s71_s19 = int_to_ptr.hbm [resolvable:$true] %s70_s19 }
   0xc   :  { %42 = dma.hbm_to_vmem [thread:$0]  %s35_s27, 10240, %s37_s30, [#allocation4], %s1949_s16, %s1949_s16, %s1950_s17  }
   0xd   :  { %s1951_s20 = smov [#allocation8]   ;;  %s89_s23 = sshll.u32 %s2466_s13, 4  ;;  %s90_s23 = int_to_ptr.hbm [resolvable:$true] %s89_s23 }
   0xe   :  { %s72_s2 = sshll.u32 %s1951_s20, 4  ;;  %s1952_s24 = smov [#allocation9]   ;;  %s73_s2 = int_to_ptr.vmem [resolvable:$true] %s72_s2 }
   0xf   :  { %78 = dma.hbm_to_vmem [thread:$0]  %s71_s19, 18432, %s73_s2, [#allocation7], %s1946_s28, %s1946_s28, %s1947_s29  }
  0x10   :  { %s91_s25 = sshll.u32 %s1952_s24, 4  ;;  %s92_s25 = int_to_ptr.vmem [resolvable:$true] %s91_s25 }
  0x11   :  { %97 = dma.hbm_to_vmem [thread:$0]  %s90_s23, 18432, %s92_s25, [#allocation10], %s1946_s28, %s1946_s28, %s1947_s29  }
  0x12   :  { %1937 = dma.done.wait [#allocation4], 10240  }
  0x13   :  { %1938 = vsyncadd [#allocation4], 4294957056 }
  0x14   :  { %1939 = dma.done.wait [#allocation7], 24576  }
  0x15   :  { %1940 = vsyncadd [#allocation7], 4294942720 }
  0x16   :  { %1941 = dma.done.wait [#allocation10], 18432  }
  0x17   :  { %1942 = vsyncadd [#allocation10], 4294948864  ;;  %vm129_vm0 = vcmask 130048   ;;  %v2057_v1 = vld [vmem:[%s2453_s0 + $0x8] sm:$0xff]  ;;  %v2064_v3 = vld [vmem:[%s2453_s0] sm:$0xff]  ;;  %v118_v35 = vlaneseq  ;;  %v1953_v40 = vmov 0.0  }
  0x18   :  { %v133_v2 = vsel %vm129_vm0, %v2057_v1, 0.0  ;;  %v130_v4 = vsel %vm129_vm0, %v2064_v3, 0.0  ;;  %v159_v15 = vld [vmem:[%s2454_s1 + $0x8] sm:$0xff]  ;;  %v158_v22 = vld [vmem:[%s2454_s1] sm:$0xff]  ;;  %v314_v45 = vld [vmem:[#allocation3 + $0x70] sm:$0xff]  ;;  %s1955_s23 = smov [#allocation11]  }
  0x19   :  { %134 = vadd.xlane.f32.xlu0 %v133_v2  ;;  %v1774_v25 = vld [vmem:[%s2456_s3] ss:$0 sm:$0xff]  ;;  %v2098_v36 = vshrl.u32 %v118_v35, 7  ;;  %v2100_v37 = vand.u32 127, %v118_v35  ;;  %v313_v48 = vld [vmem:[#allocation3 + $0x68] sm:$0xff]  ;;  %v312_v51 = vld [vmem:[#allocation3 + $0x60] sm:$0xff] }
  0x1a   :  { %v1775_v28 = vld [vmem:[%s2457_s4] ss:$0 sm:$0xff]  ;;  %v310_v55 = vld [vmem:[#allocation3 + $0x50] sm:$0xff]  ;;  %v309_v57 = vld [vmem:[#allocation3 + $0x48] sm:$0xff]  ;;  %s1711_s24 = sshll.u32 %s1955_s23, 4  ;;  %s1712_s24 = int_to_ptr.vmem [resolvable:$true] %s1711_s24 }
  0x1b   :  { %v2103_v38 = vadd.s32 8, %v2098_v36  ;;  %vm123_vm7 = vcmp.eq.s32.totalorder %v2098_v36, %v2100_v37  ;;  %v315_v44 = vld [vmem:[#allocation3 + $0x78] sm:$0xff]  ;;  %v308_v59 = vld [vmem:[#allocation3 + $0x40] sm:$0xff]  ;;  %v306_v63 = vld [vmem:[#allocation3 + $0x30] sm:$0xff]  ;;  %vm229_vm9 = vcmp.lt.s32.totalorder %v2100_v37, %v2098_v36 }
  0x1c   :  { %v2112_v41 = vsel %vm123_vm7, 1.0, %v1953_v40  ;;  %316 = vmatpush.msra.mxu1 %v315_v44  ;;  %v311_v53 = vld [vmem:[#allocation3 + $0x58] sm:$0xff]  ;;  %v305_v2 = vld [vmem:[#allocation3 + $0x28] sm:$0xff] }
  0x1d   :  { %vm124_vm8 = vcmp.eq.s32.totalorder %v2103_v38, %v2100_v37  ;;  %v307_v61 = vld [vmem:[#allocation3 + $0x38] sm:$0xff]  ;;  %vm230_vm13 = vcmp.lt.s32.totalorder %v2100_v37, %v2103_v38 }
  0x1e   :  { %v2115_v42 = vsel %vm124_vm8, 1.0, %v1953_v40  ;;  %317 = vmatpush.msra.mxu1 %v314_v45 }
  0x20   :  { %318 = vmatpush.msra.mxu1 %v313_v48 }
  0x21   :  { %131 = vadd.xlane.f32.xlu0 %v130_v4  ;;  %v304_v4 = vld [vmem:[#allocation3 + $0x20] sm:$0xff] }
  0x22   :  { %319 = vmatpush.msra.mxu1 %v312_v51 }
  0x24   :  { %320 = vmatpush.msra.mxu1 %v311_v53 }
  0x26   :  { %321 = vmatpush.msra.mxu1 %v310_v55 }
  0x28   :  { %322 = vmatpush.msra.mxu1 %v309_v57 }
  0x2a   :  { %323 = vmatpush.msra.mxu1 %v308_v59 }
  0x2c   :  { %324 = vmatpush.msra.mxu1 %v307_v61 }
  0x2e   :  { %325 = vmatpush.msra.mxu1 %v306_v63 }
  0x30   :  { %326 = vmatpush.msra.mxu1 %v305_v2 }
  0x32   :  { %327 = vmatpush.msra.mxu1 %v304_v4 }
  0x8c   :  { %v135_v5 = vpop.xlane.xlu0 %134 }
  0x8d   :  { %1783 = vrsqrt.f32 %v135_v5  ;;  %vm154_vm2 = vweird.f32 %v135_v5 }
  0x93   :  { %v1784_v6 = vpop.eup %1783 }
  0x94   :  { %v149_v7 = vmul.f32 %v1784_v6, %v135_v5  ;;  %v132_v8 = vpop.xlane.xlu0 %131  ;;  %vm155_vm1 = vweird.f32 %v1784_v6 }
  0x95   :  { %1785 = vrsqrt.f32 %v132_v8  ;;  %vm156_vm3 = vmor %vm154_vm2, %vm155_vm1  ;;  %vm144_vm5 = vweird.f32 %v132_v8 }
  0x96   :  { %v150_v9 = vmul.f32 %v1784_v6, %v149_v7 }
  0x98   :  { %v151_v10 = vmul.f32 0.5, %v150_v9 }
  0x9a   :  { %v152_v11 = vsub.f32 1.5, %v151_v10  ;;  %v302_v10 = vld [vmem:[#allocation3 + $0x10] sm:$0xff] }
  0x9b   :  { %v1786_v12 = vpop.eup %1785 }
  0x9c   :  { %v139_v13 = vmul.f32 %v1786_v12, %v132_v8  ;;  %v153_v14 = vmul.f32 %v1784_v6, %v152_v11  ;;  %vm145_vm4 = vweird.f32 %v1786_v12  ;;  %v301_v11 = vld [vmem:[#allocation3 + $0x8] sm:$0xff] }
  0x9d   :  { %vm146_vm6 = vmor %vm144_vm5, %vm145_vm4 }
  0x9e   :  { %v140_v16 = vmul.f32 %v1786_v12, %v139_v13  ;;  %v2071_v17 = vsel %vm156_vm3, %v1784_v6, %v153_v14  ;;  %v303_v6 = vld [vmem:[#allocation3 + $0x18] sm:$0xff] }
  0x9f   :  { %v161_v18 = vmul.f32 %v159_v15, %v2071_v17  ;;  %328 = vmatpush.msra.mxu1 %v303_v6 }
  0xa0   :  { %v141_v19 = vmul.f32 0.5, %v140_v16 }
  0xa1   :  { %182 = vmatpush.msra.mxu0 %v161_v18  ;;  %329 = vmatpush.msra.mxu1 %v302_v10  ;;  %v1776_v10 = vld [vmem:[%s2456_s3 + $0x1] ss:$0 sm:$0xff] }
  0xa2   :  { %v142_v20 = vsub.f32 1.5, %v141_v19 }
  0xa3   :  { %330 = vmatpush.msra.mxu1 %v301_v11 }
  0xa4   :  { %v143_v21 = vmul.f32 %v1786_v12, %v142_v20 }
  0xa6   :  { %v2077_v23 = vsel %vm146_vm6, %v1786_v12, %v143_v21  ;;  %v300_v12 = vld [vmem:[#allocation3] sm:$0xff] }
  0xa7   :  { %v160_v24 = vmul.f32 %v158_v22, %v2077_v23  ;;  %331 = vmatpush.msra.mxu1 %v300_v12 }
  0xa9   :  { %183 = vmatpush.msra.mxu0 %v160_v24 }
  0xaa   :  { %1730 = vmatmul.msk.f32.vlgmr.msra.gmra.mxu0 %vm129_vm0, %v2064_v3 }
  0xb2   :  { %1731 = vmatmul.msk.f32.gmra.mxu0 %vm129_vm0, %v2057_v1 }
 0x127   :  { %v185_v26 = vpop.f32.mrf.mxu0 }
 0x128   :  { %v191_v27 = vmul.f32 %v185_v26, %v2077_v23 }
 0x12a   :  { %v2091_v29 = vadd.f32 %v1774_v25, %v191_v27 }
 0x12c   :  { %v203_v30 = vmul.f32 %v1775_v28, %v2091_v29 }
 0x12e   :  { %205 = vadd.xlane.f32.xlu1 %v203_v30 }
 0x12f   :  { %v188_v31 = vpop.f32.mrf.mxu0 }
 0x130   :  { %v192_v32 = vmul.f32 %v188_v31, %v2071_v17 }
 0x132   :  { %v2095_v33 = vadd.f32 %v1774_v25, %v192_v32 }
 0x134   :  { %v204_v34 = vmul.f32 %v1775_v28, %v2095_v33 }
 0x136   :  { %207 = vadd.xlane.f32.xlu1 %v204_v34 }
 0x1a1   :  { %v2105_v39 = vpop.xlane.xlu1 %205 }
 0x1a2   :  { %v214_v43 = vmul.f32 %v2112_v41, %v2105_v39  ;;  %1787 = vtanh.f32 %v2105_v39 }
 0x1a4   :  { %v216_v49 = vsel %vm129_vm0, %v214_v43, 0.0 }
 0x1a8   :  { %v1788_v14 = vpop.eup %1787 }
 0x1a9   :  { %v2119_v46 = vpop.xlane.xlu1 %207 }
 0x1aa   :  { %v215_v47 = vmul.f32 %v2115_v42, %v2119_v46  ;;  %1789 = vtanh.f32 %v2119_v46 }
 0x1ac   :  { %v217_v50 = vsel %vm129_vm0, %v215_v47, 0.0 }
 0x1ad   :  { %v218_v52 = vadd.f32 %v217_v50, %v216_v49 }
 0x1af   :  { %v219_v54 = vrot.slane %v218_v52, 4 }
 0x1b0   :  { %v1790_v21 = vpop.eup %1789 }
 0x1b1   :  { %v220_v56 = vadd.f32 %v219_v54, %v218_v52 }
 0x1b3   :  { %v221_v58 = vrot.slane %v220_v56, 2 }
 0x1b5   :  { %v222_v60 = vadd.f32 %v221_v58, %v220_v56 }
 0x1b7   :  { %v223_v62 = vrot.slane %v222_v60, 1 }
 0x1b9   :  { %v224_v0 = vadd.f32 %v223_v62, %v222_v60 }
 0x1bb   :  { %vm225_vm10 = vcmp.gt.f32.partialorder %v224_v0, %v2105_v39  ;;  %vm227_vm11 = vcmp.eq.f32.partialorder %v224_v0, %v2105_v39  ;;  %vm228_vm12 = vcmp.eq.f32.partialorder %v224_v0, %v2119_v46  ;;  %vm226_vm1 = vcmp.gt.f32.partialorder %v224_v0, %v2119_v46 }
 0x1bc   :  { %vm231_vm14 = vmand %vm227_vm11, %vm229_vm9 }
 0x1bd   :  { %vm233_vm15 = vmor %vm225_vm10, %vm231_vm14 }
 0x1be   :  { %v1732_v5 = vsel %vm233_vm15, 1.0, %v1953_v40  ;;  %vm232_vm2 = vmand %vm228_vm12, %vm230_vm13 }
 0x1bf   :  { %v239_v7 = vsel %vm129_vm0, %v1732_v5, 0.0  ;;  %vm234_vm3 = vmor %vm226_vm1, %vm232_vm2 }
 0x1c0   :  { %240 = vadd.xlane.f32.xlu2 %v239_v7  ;;  %v1733_v8 = vsel %vm234_vm3, 1.0, %v1953_v40 }
 0x1c1   :  { %v242_v9 = vsel %vm129_vm0, %v1733_v8, 0.0 }
 0x1c8   :  { %243 = vadd.xlane.f32.xlu2 %v242_v9 }
 0x233   :  { %v241_v13 = vpop.xlane.xlu2 %240 }
 0x234   :  { %vm245_vm4 = vcmp.lt.f32.partialorder %v241_v13, 8.0 }
 0x235   :  { %v2145_v15 = vsel %vm245_vm4, 1.0, %v1953_v40 }
 0x236   :  { %v251_v16 = vmul.f32 %v1788_v14, %v2145_v15  ;;  %v257_v20 = vmul.f32 %v2145_v15, %v2112_v41  ;;  %v255_v39 = vmul.f32 %v2145_v15, %v2064_v3  ;;  %v276_v48 = vsub.f32 1.0, %v2145_v15  ;;  %v1777_v14 = vld [vmem:[%s2457_s4 + $0x1] ss:$0 sm:$0xff] }
 0x237   :  { %vm394_vm14 = vcmp.gt.f32.partialorder %v2145_v15, 0.0 }
 0x238   :  { %v253_v18 = vmul.f32 %v251_v16, %v2091_v29  ;;  %v259_v27 = vsel %vm129_vm0, %v257_v20, 0.0 }
 0x23a   :  { %332 = vmatmul.f32.vlgmr.msra.gmra.mxu1 %v253_v18 }
 0x23b   :  { %v244_v19 = vpop.xlane.xlu2 %243 }
 0x23c   :  { %vm246_vm5 = vcmp.lt.f32.partialorder %v244_v19, 8.0 }
 0x23d   :  { %v2153_v22 = vsel %vm246_vm5, 1.0, %v1953_v40 }
 0x23e   :  { %v252_v24 = vmul.f32 %v1790_v21, %v2153_v22  ;;  %v258_v25 = vmul.f32 %v2153_v22, %v2115_v42  ;;  %v256_v44 = vmul.f32 %v2153_v22, %v2057_v1  ;;  %v277_v49 = vsub.f32 1.0, %v2153_v22 }
 0x23f   :  { %vm395_vm15 = vcmp.gt.f32.partialorder %v2153_v22, 0.0 }
 0x240   :  { %v254_v26 = vmul.f32 %v252_v24, %v2095_v33  ;;  %v260_v28 = vsel %vm129_vm0, %v258_v25, 0.0 }
 0x241   :  { %v261_v29 = vadd.f32 %v260_v28, %v259_v27  ;;  %v498_v27 = vld [vmem:[#allocation3 + $0xf8] sm:$0xff]  ;;  %v497_v28 = vld [vmem:[#allocation3 + $0xf0] sm:$0xff] }
 0x242   :  { %335 = vmatmul.f32.gmra.mxu1 %v254_v26  ;;  %499 = vmatpush.msra.mxu3 %v498_v27 }
 0x243   :  { %v262_v30 = vrot.slane %v261_v29, 4 }
 0x244   :  { %500 = vmatpush.msra.mxu3 %v497_v28 }
 0x245   :  { %v263_v31 = vadd.f32 %v262_v30, %v261_v29  ;;  %v496_v29 = vld [vmem:[#allocation3 + $0xe8] sm:$0xff] }
 0x246   :  { %501 = vmatpush.msra.mxu3 %v496_v29 }
 0x247   :  { %v264_v32 = vrot.slane %v263_v31, 2 }
 0x249   :  { %v265_v34 = vadd.f32 %v264_v32, %v263_v31  ;;  %v495_v31 = vld [vmem:[#allocation3 + $0xe0] sm:$0xff] }
 0x24a   :  { %502 = vmatpush.msra.mxu3 %v495_v31 }
 0x24b   :  { %v266_v35 = vrot.slane %v265_v34, 1 }
 0x24d   :  { %v267_v43 = vadd.f32 %v266_v35, %v265_v34  ;;  %v494_v35 = vld [vmem:[#allocation3 + $0xd8] sm:$0xff] }
 0x24e   :  { %503 = vmatpush.msra.mxu3 %v494_v35 }
 0x24f   :  { %v2165_v45 = vmul.f32 %v267_v43, %v255_v39  ;;  %v2167_v33 = vmul.f32 %v267_v43, %v256_v44  ;;  %v493_v44 = vld [vmem:[#allocation3 + $0xd0] sm:$0xff] }
 0x250   :  { %504 = vmatpush.msra.mxu3 %v493_v44 }
 0x251   :  { %v270_v46 = vsel %vm129_vm0, %v2165_v45, 0.0  ;;  %v273_v47 = vsel %vm129_vm0, %v2167_v33, 0.0 }
 0x252   :  { %271 = vadd.xlane.f32.xlu1 %v270_v46  ;;  %274 = vadd.xlane.f32.xlu0 %v273_v47 }
 0x2b7   :  { %v333_v57 = vpop.f32.mrf.mxu1 }
 0x2bf   :  { %v336_v5 = vpop.f32.mrf.mxu1 }
 0x2c5   :  { %v272_v50 = vpop.xlane.xlu1 %271  ;;  %v275_v51 = vpop.xlane.xlu0 %274 }
 0x2c6   :  { %v278_v52 = vadd.f32 %v276_v48, %v272_v50  ;;  %v279_v53 = vadd.f32 %v277_v49, %v275_v51  ;;  %v492_v48 = vld [vmem:[#allocation3 + $0xc8] sm:$0xff]  ;;  %v491_v50 = vld [vmem:[#allocation3 + $0xc0] sm:$0xff] }
 0x2c7   :  { %505 = vmatpush.msra.mxu3 %v492_v48 }
 0x2c8   :  { %1791 = vrsqrt.f32 %v278_v52  ;;  %vm286_vm8 = vweird.f32 %v278_v52  ;;  %vm296_vm11 = vweird.f32 %v279_v53 }
 0x2c9   :  { %1793 = vrsqrt.f32 %v279_v53  ;;  %506 = vmatpush.msra.mxu3 %v491_v50 }
 0x2ce   :  { %v1792_v54 = vpop.eup %1791 }
 0x2cf   :  { %v1794_v55 = vpop.eup %1793  ;;  %v281_v56 = vmul.f32 %v1792_v54, %v278_v52  ;;  %vm287_vm6 = vweird.f32 %v1792_v54  ;;  %v490_v52 = vld [vmem:[#allocation3 + $0xb8] sm:$0xff] }
 0x2d0   :  { %v291_v58 = vmul.f32 %v1794_v55, %v279_v53  ;;  %vm297_vm7 = vweird.f32 %v1794_v55  ;;  %vm288_vm10 = vmor %vm286_vm8, %vm287_vm6  ;;  %507 = vmatpush.msra.mxu3 %v490_v52 }
 0x2d1   :  { %v282_v59 = vmul.f32 %v1792_v54, %v281_v56  ;;  %vm298_vm12 = vmor %vm296_vm11, %vm297_vm7  ;;  %v488_v56 = vld [vmem:[#allocation3 + $0xa8] sm:$0xff] }
 0x2d2   :  { %v292_v60 = vmul.f32 %v1794_v55, %v291_v58  ;;  %v487_v58 = vld [vmem:[#allocation3 + $0xa0] sm:$0xff] }
 0x2d3   :  { %v283_v61 = vmul.f32 0.5, %v282_v59 }
 0x2d4   :  { %v293_v62 = vmul.f32 0.5, %v292_v60  ;;  %v486_v60 = vld [vmem:[#allocation3 + $0x98] sm:$0xff] }
 0x2d5   :  { %v284_v63 = vsub.f32 1.5, %v283_v61 }
 0x2d6   :  { %v294_v0 = vsub.f32 1.5, %v293_v62 }
 0x2d7   :  { %v285_v2 = vmul.f32 %v1792_v54, %v284_v63 }
 0x2d8   :  { %v295_v4 = vmul.f32 %v1794_v55, %v294_v0 }
 0x2d9   :  { %v2177_v7 = vsel %vm288_vm10, %v1792_v54, %v285_v2  ;;  %v489_v54 = vld [vmem:[#allocation3 + $0xb0] sm:$0xff] }
 0x2da   :  { %v2175_v6 = vsel %vm298_vm12, %v1794_v55, %v295_v4  ;;  %v339_v9 = vmul.f32 %v333_v57, %v2177_v7  ;;  %508 = vmatpush.msra.mxu3 %v489_v54  ;;  %v485_v4 = vld [vmem:[#allocation3 + $0x90] sm:$0xff]  ;;  %v648_v54 = vld [vmem:[#allocation6 + $0xd8] sm:$0xff] }
 0x2db   :  { %v340_v8 = vmul.f32 %v336_v5, %v2175_v6  ;;  %v484_v5 = vld [vmem:[#allocation3 + $0x88] sm:$0xff] }
 0x2dc   :  { %509 = vmatpush.msra.mxu3 %v488_v56  ;;  %v639_v56 = vld [vmem:[#allocation6 + $0x90] sm:$0xff] }
 0x2dd   :  { %361 = vmatpush.msra.mxu2 %v340_v8  ;;  %v483_v8 = vld [vmem:[#allocation3 + $0x80] sm:$0xff] }
 0x2de   :  { %510 = vmatpush.msra.mxu3 %v487_v58  ;;  %v630_v58 = vld [vmem:[#allocation6 + $0x48] sm:$0xff] }
 0x2df   :  { %362 = vmatpush.msra.mxu2 %v339_v9  ;;  %v666_v9 = vld [vmem:[#allocation6 + $0x168] sm:$0xff] }
 0x2e0   :  { %1736 = vmatmul.msk.f32.vlgmr.msra.gmra.mxu2 %vm129_vm0, %v2165_v45  ;;  %511 = vmatpush.msra.mxu3 %v486_v60  ;;  %v624_v60 = vld [vmem:[#allocation6 + $0x18] sm:$0xff] }
 0x2e1   :  { %677 = vmatpush.msrb.mxu2 %v666_v9 }
 0x2e2   :  { %512 = vmatpush.msra.mxu3 %v485_v4 }
 0x2e4   :  { %513 = vmatpush.msra.mxu3 %v484_v5 }
 0x2e6   :  { %514 = vmatpush.msra.mxu3 %v483_v8  ;;  %v665_v8 = vld [vmem:[#allocation6 + $0x160] sm:$0xff] }
 0x2e8   :  { %1737 = vmatmul.msk.f32.gmra.mxu2 %vm129_vm0, %v2167_v33 }
 0x363   :  { %v364_v11 = vpop.f32.mrf.mxu2 }
 0x364   :  { %v370_v12 = vmul.f32 %v364_v11, %v2177_v7  ;;  %v660_v11 = vld [vmem:[#allocation6 + $0x138] sm:$0xff] }
 0x366   :  { %v377_v13 = vadd.f32 %v1776_v10, %v370_v12  ;;  %v657_v12 = vld [vmem:[#allocation6 + $0x120] sm:$0xff] }
 0x368   :  { %v2193_v16 = vmul.f32 %v2145_v15, %v377_v13  ;;  %v654_v13 = vld [vmem:[#allocation6 + $0x108] sm:$0xff] }
 0x36a   :  { %v386_v18 = vmul.f32 %v1777_v14, %v2193_v16 }
 0x36b   :  { %v367_v19 = vpop.f32.mrf.mxu2 }
 0x36c   :  { %v371_v20 = vmul.f32 %v367_v19, %v2175_v6  ;;  %388 = vadd.xlane.f32.xlu2 %v386_v18  ;;  %v651_v18 = vld [vmem:[#allocation6 + $0xf0] sm:$0xff] }
 0x36e   :  { %v378_v21 = vadd.f32 %v1776_v10, %v371_v20  ;;  %v663_v10 = vld [vmem:[#allocation6 + $0x150] sm:$0xff] }
 0x36f   :  { %678 = vmatpush.msrb.mxu2 %v663_v10 }
 0x370   :  { %v2198_v24 = vmul.f32 %v2153_v22, %v378_v21 }
 0x371   :  { %679 = vmatpush.msrb.mxu2 %v660_v11  ;;  %v662_v11 = vld [vmem:[#allocation6 + $0x148] sm:$0xff] }
 0x372   :  { %v387_v25 = vmul.f32 %v1777_v14, %v2198_v24 }
 0x373   :  { %680 = vmatpush.msrb.mxu2 %v657_v12  ;;  %v659_v12 = vld [vmem:[#allocation6 + $0x130] sm:$0xff] }
 0x374   :  { %390 = vadd.xlane.f32.xlu0 %v387_v25 }
 0x375   :  { %681 = vmatpush.msrb.mxu2 %v654_v13  ;;  %v656_v13 = vld [vmem:[#allocation6 + $0x118] sm:$0xff] }
 0x377   :  { %682 = vmatpush.msrb.mxu2 %v651_v18 }
 0x379   :  { %683 = vmatpush.msrb.mxu2 %v648_v54  ;;  %v632_v54 = vld [vmem:[#allocation6 + $0x58] sm:$0xff] }
 0x3df   :  { %v2201_v26 = vpop.xlane.xlu2 %388 }
 0x3e0   :  { %v396_v30 = vsel %vm394_vm14, %v2201_v26, -1e+30  ;;  %1795 = vtanh.f32 %v2201_v26 }
 0x3e1   :  { %v398_v32 = vmul.f32 %v2112_v41, %v396_v30 }
 0x3e3   :  { %v400_v46 = vsel %vm129_vm0, %v398_v32, 0.0 }
 0x3e6   :  { %v1796_v25 = vpop.eup %1795 }
 0x3e7   :  { %v2207_v34 = vpop.xlane.xlu0 %390 }
 0x3e8   :  { %v397_v39 = vsel %vm395_vm15, %v2207_v34, -1e+30  ;;  %1797 = vtanh.f32 %v2207_v34 }
 0x3e9   :  { %v399_v43 = vmul.f32 %v2115_v42, %v397_v39 }
 0x3eb   :  { %v401_v47 = vsel %vm129_vm0, %v399_v43, 0.0 }
 0x3ec   :  { %v402_v49 = vadd.f32 %v401_v47, %v400_v46 }
 0x3ee   :  { %v403_v51 = vrot.slane %v402_v49, 4  ;;  %v1798_v35 = vpop.eup %1797 }
 0x3f0   :  { %v404_v53 = vadd.f32 %v403_v51, %v402_v49 }
 0x3f2   :  { %v405_v55 = vrot.slane %v404_v53, 2 }
 0x3f4   :  { %v406_v57 = vadd.f32 %v405_v55, %v404_v53  ;;  %v645_v55 = vld [vmem:[#allocation6 + $0xc0] sm:$0xff] }
 0x3f5   :  { %684 = vmatpush.msrb.mxu2 %v645_v55 }
 0x3f6   :  { %v407_v59 = vrot.slane %v406_v57, 1 }
 0x3f8   :  { %v408_v61 = vadd.f32 %v407_v59, %v406_v57  ;;  %v633_v57 = vld [vmem:[#allocation6 + $0x60] sm:$0xff]  ;;  %v627_v59 = vld [vmem:[#allocation6 + $0x30] sm:$0xff] }
 0x3fa   :  { %vm412_vm1 = vcmp.eq.f32.partialorder %v408_v61, %v397_v39  ;;  %vm410_vm2 = vcmp.gt.f32.partialorder %v408_v61, %v397_v39  ;;  %vm411_vm3 = vcmp.eq.f32.partialorder %v408_v61, %v396_v30  ;;  %vm409_vm5 = vcmp.gt.f32.partialorder %v408_v61, %v396_v30  ;;  %v621_v61 = vld [vmem:[#allocation6] sm:$0xff] }
 0x3fb   :  { %vm414_vm4 = vmand %vm412_vm1, %vm230_vm13 }
 0x3fc   :  { %vm416_vm6 = vmor %vm410_vm2, %vm414_vm4 }
 0x3fd   :  { %v1741_v62 = vsel %vm416_vm6, 1.0, %v1953_v40  ;;  %vm413_vm7 = vmand %vm411_vm3, %vm229_vm9 }
 0x3fe   :  { %v424_v63 = vsel %vm129_vm0, %v1741_v62, 0.0  ;;  %vm415_vm8 = vmor %vm409_vm5, %vm413_vm7  ;;  %v2256_v62 = vld [vmem:[%s2458_s5] sm:$0x1] }
 0x3ff   :  { %425 = vadd.xlane.f32.xlu2 %v424_v63  ;;  %v1740_v0 = vsel %vm415_vm8, 1.0, %v1953_v40  ;;  %v668_v63 = vld [vmem:[#allocation6 + $0x178] sm:$0xff] }
 0x400   :  { %v421_v2 = vsel %vm129_vm0, %v1740_v0, 0.0  ;;  %717 = vmatpush.msrb.mxu1 %v668_v63  ;;  %v1954_v63 = vmov 0  }
 0x401   :  { %422 = vadd.xlane.f32.xlu1 %v421_v2  ;;  %1772 = vset.pattern.permute.xlu2 %v1954_v63 }
 0x402   :  { %718 = vmatpush.msrb.mxu1 %v665_v8  ;;  %1773 = vset.pattern.permute.xlu0 %v1954_v63  ;;  %v655_v8 = vld [vmem:[#allocation6 + $0x110] sm:$0xff] }
 0x404   :  { %719 = vmatpush.msrb.mxu1 %v662_v11  ;;  %v854_v11 = vld [vmem:[#allocation8 + $0x2d0] sm:$0xff] }
 0x406   :  { %720 = vmatpush.msrb.mxu1 %v659_v12  ;;  %v652_v12 = vld [vmem:[#allocation6 + $0xf8] sm:$0xff] }
 0x408   :  { %721 = vmatpush.msrb.mxu1 %v656_v13  ;;  %v851_v13 = vld [vmem:[#allocation8 + $0x2b8] sm:$0xff] }
 0x472   :  { %v426_v14 = vpop.xlane.xlu2 %425 }
 0x473   :  { %vm428_vm10 = vcmp.lt.f32.partialorder %v426_v14, 4.0  ;;  %v653_v14 = vld [vmem:[#allocation6 + $0x100] sm:$0xff] }
 0x474   :  { %v2225_v19 = vsel %vm428_vm10, 1.0, %v1953_v40  ;;  %v423_v20 = vpop.xlane.xlu1 %422  ;;  %722 = vmatpush.msrb.mxu1 %v653_v14  ;;  %v810_v14 = vld [vmem:[#allocation8 + $0x170] sm:$0xff] }
 0x475   :  { %vm427_vm11 = vcmp.lt.f32.partialorder %v423_v20, 4.0  ;;  %v440_v21 = vmul.f32 %v2225_v19, %v2115_v42  ;;  %v434_v34 = vmul.f32 %v1798_v35, %v2225_v19  ;;  %v438_v49 = vmul.f32 %v2225_v19, %v2057_v1  ;;  %v642_v1 = vld [vmem:[#allocation6 + $0xa8] sm:$0xff]  ;;  %v644_v35 = vld [vmem:[#allocation6 + $0xb8] sm:$0xff] }
 0x476   :  { %v2231_v26 = vsel %vm427_vm11, 1.0, %v1953_v40  ;;  %685 = vmatpush.msrb.mxu2 %v642_v1  ;;  %v459_v0 = vsub.f32 1.0, %v2225_v19  ;;  %v667_v1 = vld [vmem:[#allocation6 + $0x170] sm:$0xff]  ;;  %vm578_vm5 = vcmp.gt.f32.partialorder %v2225_v19, 0.0 }
 0x477   :  { %v433_v27 = vmul.f32 %v1796_v25, %v2231_v26  ;;  %v439_v28 = vmul.f32 %v2231_v26, %v2112_v41  ;;  %v442_v29 = vsel %vm129_vm0, %v440_v21, 0.0  ;;  %v436_v46 = vmul.f32 %v434_v34, %v2198_v24 }
 0x478   :  { %686 = vmatpush.msrb.mxu2 %v639_v56  ;;  %v458_v2 = vsub.f32 1.0, %v2231_v26  ;;  %v629_v56 = vld [vmem:[#allocation6 + $0x40] sm:$0xff]  ;;  %vm577_vm4 = vcmp.gt.f32.partialorder %v2231_v26, 0.0 }
 0x479   :  { %v435_v30 = vmul.f32 %v433_v27, %v2193_v16  ;;  %v441_v31 = vsel %vm129_vm0, %v439_v28, 0.0  ;;  %v437_v16 = vmul.f32 %v2231_v26, %v2064_v3  ;;  %v636_v3 = vld [vmem:[#allocation6 + $0x78] sm:$0xff]  ;;  %v650_v27 = vld [vmem:[#allocation6 + $0xe8] sm:$0xff] }
 0x47a   :  { %v443_v32 = vadd.f32 %v442_v29, %v441_v31  ;;  %687 = vmatpush.msrb.mxu2 %v636_v3  ;;  %723 = vmatpush.msrb.mxu1 %v650_v27  ;;  %v664_v3 = vld [vmem:[#allocation6 + $0x158] sm:$0xff] }
 0x47b   :  { %515 = vmatmul.f32.vlgmr.msra.gmra.mxu3 %v435_v30  ;;  %v647_v30 = vld [vmem:[#allocation6 + $0xd0] sm:$0xff]  ;;  %v791_v27 = vld [vmem:[#allocation8 + $0xd8] sm:$0xff] }
 0x47c   :  { %v444_v39 = vrot.slane %v443_v32, 4  ;;  %688 = vmatpush.msrb.mxu2 %v633_v57  ;;  %724 = vmatpush.msrb.mxu1 %v647_v30  ;;  %v626_v57 = vld [vmem:[#allocation6 + $0x28] sm:$0xff]  ;;  %v643_v30 = vld [vmem:[#allocation6 + $0xb0] sm:$0xff] }
 0x47e   :  { %v445_v43 = vadd.f32 %v444_v39, %v443_v32  ;;  %689 = vmatpush.msrb.mxu2 %v630_v58  ;;  %725 = vmatpush.msrb.mxu1 %v644_v35  ;;  %v623_v58 = vld [vmem:[#allocation6 + $0x10] sm:$0xff] }
 0x47f   :  { %v782_v35 = vld [vmem:[#allocation8 + $0x90] sm:$0xff] }
 0x480   :  { %v446_v44 = vrot.slane %v445_v43, 2  ;;  %690 = vmatpush.msrb.mxu2 %v627_v59  ;;  %v809_v59 = vld [vmem:[#allocation8 + $0x168] sm:$0xff] }
 0x481   :  { %916 = vmatpush.msrb.mxu3 %v809_v59  ;;  %v849_v59 = vld [vmem:[#allocation8 + $0x2a8] sm:$0xff] }
 0x482   :  { %v447_v47 = vadd.f32 %v446_v44, %v445_v43  ;;  %691 = vmatpush.msrb.mxu2 %v624_v60  ;;  %v641_v43 = vld [vmem:[#allocation6 + $0xa0] sm:$0xff]  ;;  %v806_v60 = vld [vmem:[#allocation8 + $0x150] sm:$0xff] }
 0x483   :  { %518 = vmatmul.f32.gmra.mxu3 %v436_v46  ;;  %726 = vmatpush.msrb.mxu1 %v641_v43  ;;  %v634_v43 = vld [vmem:[#allocation6 + $0x68] sm:$0xff] }
 0x484   :  { %v448_v48 = vrot.slane %v447_v47, 1  ;;  %692 = vmatpush.msrb.mxu2 %v621_v61  ;;  %v661_v61 = vld [vmem:[#allocation6 + $0x140] sm:$0xff]  ;;  %917 = vmatpush.msrb.mxu3 %v806_v60 }
 0x485   :  { %693 = vmatmul.f32.vlgmr.msrb.gmra.mxu2 %v2256_v62  ;;  %v2276_v60 = vld [vmem:[%s2461_s8] sm:$0x7]  ;;  %s1713_s8 = sshll.u32 %s2468_s15, 4  ;;  %s1714_s8 = int_to_ptr.hbm [resolvable:$true] %s1713_s8 }
 0x486   :  { %v449_v50 = vadd.f32 %v448_v48, %v447_v47  ;;  %v638_v47 = vld [vmem:[#allocation6 + $0x88] sm:$0xff] }
 0x487   :  { %727 = vmatpush.msrb.mxu1 %v638_v47  ;;  %v773_v47 = vld [vmem:[#allocation8 + $0x48] sm:$0xff] }
 0x488   :  { %v2245_v51 = vmul.f32 %v449_v50, %v438_v49  ;;  %v2247_v52 = vmul.f32 %v449_v50, %v437_v16  ;;  %v635_v16 = vld [vmem:[#allocation6 + $0x70] sm:$0xff] }
 0x489   :  { %728 = vmatpush.msrb.mxu1 %v635_v16  ;;  %v625_v16 = vld [vmem:[#allocation6 + $0x20] sm:$0xff] }
 0x48a   :  { %v455_v53 = vsel %vm129_vm0, %v2245_v51, 0.0  ;;  %v452_v24 = vsel %vm129_vm0, %v2247_v52, 0.0 }
 0x48b   :  { %456 = vadd.xlane.f32.xlu0 %v455_v53  ;;  %453 = vadd.xlane.f32.xlu1 %v452_v24 }
 0x48c   :  { %729 = vmatpush.msrb.mxu1 %v632_v54  ;;  %v622_v54 = vld [vmem:[#allocation6 + $0x8] sm:$0xff] }
 0x48e   :  { %730 = vmatpush.msrb.mxu1 %v629_v56  ;;  %v905_v56 = vld [vmem:[#allocation8 + $0x468] sm:$0xff] }
 0x490   :  { %731 = vmatpush.msrb.mxu1 %v626_v57  ;;  %v902_v57 = vld [vmem:[#allocation8 + $0x450] sm:$0xff] }
 0x492   :  { %732 = vmatpush.msrb.mxu1 %v623_v58  ;;  %v852_v58 = vld [vmem:[#allocation8 + $0x2c0] sm:$0xff] }
 0x493   :  { %733 = vmatmul.f32.vlgmr.msrb.gmra.mxu1 %v2256_v62 }
 0x494   :  { %976 = vmatpush.msra.mxu1 %v810_v14  ;;  %v893_v14 = vld [vmem:[#allocation8 + $0x408] sm:$0xff] }
 0x4fe   :  { %v457_v4 = vpop.xlane.xlu0 %456  ;;  %v454_v5 = vpop.xlane.xlu1 %453 }
 0x4ff   :  { %v461_v9 = vadd.f32 %v459_v0, %v457_v4  ;;  %v460_v10 = vadd.f32 %v458_v2, %v454_v5  ;;  %v516_v25 = vpop.f32.mrf.mxu3  ;;  %v803_v0 = vld [vmem:[#allocation8 + $0x138] sm:$0xff]  ;;  %v658_v2 = vld [vmem:[#allocation6 + $0x128] sm:$0xff]  ;;  %v800_v4 = vld [vmem:[#allocation8 + $0x120] sm:$0xff] }
 0x500   :  { %v1096_v5 = vld [vmem:[#allocation2] sm:$0x1]  ;;  %918 = vmatpush.msrb.mxu3 %v803_v0 }
 0x501   :  { %1799 = vrsqrt.f32 %v461_v9  ;;  %vm478_vm15 = vweird.f32 %v461_v9  ;;  %vm468_vm2 = vweird.f32 %v460_v10  ;;  %1100 = vperm.xlu2 %1772, %v1096_v5   ;;  %v899_v0 = vld [vmem:[#allocation8 + $0x438] sm:$0xff]  ;;  %v846_v5 = vld [vmem:[#allocation8 + $0x290] sm:$0xff] }
 0x502   :  { %1801 = vrsqrt.f32 %v460_v10  ;;  %919 = vmatpush.msrb.mxu3 %v800_v4  ;;  %v804_v4 = vld [vmem:[#allocation8 + $0x140] sm:$0xff] }
 0x507   :  { %v1800_v18 = vpop.eup %1799  ;;  %v519_v50 = vpop.f32.mrf.mxu3 }
 0x508   :  { %v1802_v20 = vpop.eup %1801  ;;  %v473_v21 = vmul.f32 %v1800_v18, %v461_v9  ;;  %vm479_vm12 = vweird.f32 %v1800_v18  ;;  %v857_v9 = vld [vmem:[#allocation8 + $0x2e8] sm:$0xff]  ;;  %v694_v63 = vpop.f32.mrf.mxu2 }
 0x509   :  { %v463_v28 = vmul.f32 %v1802_v20, %v460_v10  ;;  %vm469_vm14 = vweird.f32 %v1802_v20  ;;  %vm480_vm1 = vmor %vm478_vm15, %vm479_vm12  ;;  %v797_v10 = vld [vmem:[#allocation8 + $0x108] sm:$0xff]  ;;  %936 = vmatpush.msra.mxu2 %v857_v9  ;;  %v896_v9 = vld [vmem:[#allocation8 + $0x420] sm:$0xff] }
 0x50a   :  { %v474_v29 = vmul.f32 %v1800_v18, %v473_v21  ;;  %vm470_vm3 = vmor %vm468_vm2, %vm469_vm14  ;;  %v649_v21 = vld [vmem:[#allocation6 + $0xe0] sm:$0xff]  ;;  %920 = vmatpush.msrb.mxu3 %v797_v10  ;;  %v801_v10 = vld [vmem:[#allocation8 + $0x128] sm:$0xff] }
 0x50b   :  { %v464_v31 = vmul.f32 %v1802_v20, %v463_v28  ;;  %937 = vmatpush.msra.mxu2 %v854_v11  ;;  %v646_v28 = vld [vmem:[#allocation6 + $0xc8] sm:$0xff] }
 0x50c   :  { %v475_v32 = vmul.f32 0.5, %v474_v29  ;;  %v788_v29 = vld [vmem:[#allocation8 + $0xc0] sm:$0xff] }
 0x50d   :  { %v465_v39 = vmul.f32 0.5, %v464_v31  ;;  %938 = vmatpush.msra.mxu2 %v851_v13  ;;  %v785_v31 = vld [vmem:[#allocation8 + $0xa8] sm:$0xff]  ;;  %v839_v13 = vld [vmem:[#allocation8 + $0x258] sm:$0xff] }
 0x50e   :  { %v476_v34 = vsub.f32 1.5, %v475_v32  ;;  %v640_v32 = vld [vmem:[#allocation6 + $0x98] sm:$0xff] }
 0x50f   :  { %v466_v44 = vsub.f32 1.5, %v465_v39  ;;  %v637_v39 = vld [vmem:[#allocation6 + $0x80] sm:$0xff] }
 0x510   :  { %v477_v46 = vmul.f32 %v1800_v18, %v476_v34  ;;  %v779_v34 = vld [vmem:[#allocation8 + $0x78] sm:$0xff] }
 0x511   :  { %v467_v48 = vmul.f32 %v1802_v20, %v466_v44  ;;  %v776_v44 = vld [vmem:[#allocation8 + $0x60] sm:$0xff] }
 0x512   :  { %v2261_v49 = vsel %vm480_vm1, %v1800_v18, %v477_v46  ;;  %v794_v18 = vld [vmem:[#allocation8 + $0xf0] sm:$0xff] }
 0x513   :  { %v2263_v53 = vsel %vm470_vm3, %v1802_v20, %v467_v48  ;;  %v523_v24 = vmul.f32 %v519_v50, %v2261_v49  ;;  %v807_v20 = vld [vmem:[#allocation8 + $0x158] sm:$0xff]  ;;  %921 = vmatpush.msrb.mxu3 %v794_v18  ;;  %v631_v46 = vld [vmem:[#allocation6 + $0x50] sm:$0xff] }
 0x514   :  { %v522_v55 = vmul.f32 %v516_v25, %v2263_v53  ;;  %v848_v25 = vld [vmem:[#allocation8 + $0x2a0] sm:$0xff]  ;;  %977 = vmatpush.msra.mxu1 %v807_v20  ;;  %v628_v48 = vld [vmem:[#allocation6 + $0x38] sm:$0xff]  ;;  %v770_v50 = vld [vmem:[#allocation8 + $0x30] sm:$0xff] }
 0x515   :  { %544 = vmatpush.msrb.mxu0 %v523_v24  ;;  %939 = vmatpush.msra.mxu2 %v848_v25  ;;  %v767_v24 = vld [vmem:[#allocation8 + $0x18] sm:$0xff]  ;;  %v798_v18 = vld [vmem:[#allocation8 + $0x110] sm:$0xff]  ;;  %v840_v20 = vld [vmem:[#allocation8 + $0x260] sm:$0xff] }
 0x516   :  { %922 = vmatpush.msrb.mxu3 %v791_v27  ;;  %978 = vmatpush.msra.mxu1 %v804_v4  ;;  %v890_v25 = vld [vmem:[#allocation8 + $0x3f0] sm:$0xff]  ;;  %v795_v27 = vld [vmem:[#allocation8 + $0xf8] sm:$0xff] }
 0x517   :  { %545 = vmatpush.msrb.mxu0 %v522_v55  ;;  %v764_v55 = vld [vmem:[#allocation8] sm:$0xff]  ;;  %v819_v4 = vld [vmem:[#allocation8 + $0x1b8] sm:$0xff] }
 0x518   :  { %1744 = vmatmul.msk.f32.vlgmr.msrb.gmra.mxu0 %vm129_vm0, %v2247_v52  ;;  %923 = vmatpush.msrb.mxu3 %v788_v29 }
 0x519   :  { %697 = vmatpush.msra.mxu0 %v667_v1  ;;  %v858_v1 = vld [vmem:[#allocation8 + $0x2f0] sm:$0xff]  ;;  %979 = vmatpush.msra.mxu1 %v801_v10 }
 0x51a   :  { %924 = vmatpush.msrb.mxu3 %v785_v31  ;;  %v833_v31 = vld [vmem:[#allocation8 + $0x228] sm:$0xff] }
 0x51b   :  { %698 = vmatpush.msra.mxu0 %v664_v3  ;;  %v855_v3 = vld [vmem:[#allocation8 + $0x2d8] sm:$0xff]  ;;  %980 = vmatpush.msra.mxu1 %v798_v18 }
 0x51c   :  { %925 = vmatpush.msrb.mxu3 %v782_v35  ;;  %v792_v35 = vld [vmem:[#allocation8 + $0xe0] sm:$0xff] }
 0x51d   :  { %699 = vmatpush.msra.mxu0 %v661_v61  ;;  %v671_v61 = vperm.slane %v2276_v60, 0  ;;  %981 = vmatpush.msra.mxu1 %v795_v27  ;;  %v906_v27 = vld [vmem:[#allocation8 + $0x470] sm:$0xff] }
 0x51e   :  { %926 = vmatpush.msrb.mxu3 %v779_v34 }
 0x51f   :  { %700 = vmatpush.msra.mxu0 %v658_v2  ;;  %v2279_v2 = vadd.f32 %v694_v63, %v671_v61  ;;  %982 = vmatpush.msra.mxu1 %v792_v35  ;;  %v822_v61 = vld [vmem:[#allocation8 + $0x1d0] sm:$0xff]  ;;  %v765_v35 = vld [vmem:[#allocation8 + $0x8] sm:$0xff] }
 0x520   :  { %1745 = vmatmul.msk.f32.gmra.mxu0 %vm129_vm0, %v2245_v51  ;;  %927 = vmatpush.msrb.mxu3 %v776_v44  ;;  %v884_v44 = vld [vmem:[#allocation8 + $0x3c0] sm:$0xff]  ;;  %v818_v63 = vld [vmem:[#allocation8 + $0x1b0] sm:$0xff] }
 0x521   :  { %701 = vmatpush.msra.mxu0 %v655_v8  ;;  %v842_v8 = vld [vmem:[#allocation8 + $0x270] sm:$0xff]  ;;  %v740_v11 = vmul.f32 0.044715, %v2279_v2 }
 0x522   :  { %928 = vmatpush.msrb.mxu3 %v773_v47  ;;  %v831_v47 = vld [vmem:[#allocation8 + $0x218] sm:$0xff] }
 0x523   :  { %702 = vmatpush.msra.mxu0 %v652_v12  ;;  %v843_v12 = vld [vmem:[#allocation8 + $0x278] sm:$0xff]  ;;  %v743_v29 = vmul.f32 %v740_v11, %v2279_v2  ;;  %v774_v11 = vld [vmem:[#allocation8 + $0x50] sm:$0xff] }
 0x524   :  { %929 = vmatpush.msrb.mxu3 %v770_v50  ;;  %v881_v50 = vld [vmem:[#allocation8 + $0x3a8] sm:$0xff] }
 0x525   :  { %703 = vmatpush.msra.mxu0 %v649_v21  ;;  %v836_v21 = vld [vmem:[#allocation8 + $0x240] sm:$0xff] }
 0x526   :  { %930 = vmatpush.msrb.mxu3 %v767_v24  ;;  %v786_v24 = vld [vmem:[#allocation8 + $0xb0] sm:$0xff] }
 0x527   :  { %704 = vmatpush.msra.mxu0 %v646_v28  ;;  %v837_v28 = vld [vmem:[#allocation8 + $0x248] sm:$0xff] }
 0x528   :  { %931 = vmatpush.msrb.mxu3 %v764_v55  ;;  %v824_v55 = vld [vmem:[#allocation8 + $0x1e0] sm:$0xff] }
 0x529   :  { %705 = vmatpush.msra.mxu0 %v643_v30  ;;  %v746_v30 = vmul.f32 %v743_v29, %v2279_v2  ;;  %v768_v29 = vld [vmem:[#allocation8 + $0x20] sm:$0xff] }
 0x52a   :  { %996 = vmatpush.msra.mxu3 %v858_v1  ;;  %v878_v1 = vld [vmem:[#allocation8 + $0x390] sm:$0xff] }
 0x52b   :  { %706 = vmatpush.msra.mxu0 %v640_v32  ;;  %v887_v32 = vld [vmem:[#allocation8 + $0x3d8] sm:$0xff]  ;;  %v749_v34 = vadd.f32 %v746_v30, %v2279_v2 }
 0x52c   :  { %997 = vmatpush.msra.mxu3 %v855_v3  ;;  %v825_v3 = vld [vmem:[#allocation8 + $0x1e8] sm:$0xff]  ;;  %v903_v30 = vld [vmem:[#allocation8 + $0x458] sm:$0xff] }
 0x52d   :  { %707 = vmatpush.msra.mxu0 %v637_v39  ;;  %v834_v39 = vld [vmem:[#allocation8 + $0x230] sm:$0xff] }
 0x52e   :  { %998 = vmatpush.msra.mxu3 %v852_v58  ;;  %v875_v58 = vld [vmem:[#allocation8 + $0x378] sm:$0xff] }
 0x52f   :  { %708 = vmatpush.msra.mxu0 %v634_v43  ;;  %v830_v43 = vld [vmem:[#allocation8 + $0x210] sm:$0xff] }
 0x530   :  { %999 = vmatpush.msra.mxu3 %v849_v59  ;;  %v780_v59 = vld [vmem:[#allocation8 + $0x80] sm:$0xff] }
 0x531   :  { %709 = vmatpush.msra.mxu0 %v631_v46  ;;  %v789_v46 = vld [vmem:[#allocation8 + $0xc8] sm:$0xff] }
 0x532   :  { %1000 = vmatpush.msra.mxu3 %v846_v5  ;;  %983 = vmatpush.msra.mxu1 %v789_v46  ;;  %v815_v5 = vld [vmem:[#allocation8 + $0x198] sm:$0xff]  ;;  %v897_v46 = vld [vmem:[#allocation8 + $0x428] sm:$0xff] }
 0x533   :  { %710 = vmatpush.msra.mxu0 %v628_v48  ;;  %v827_v48 = vld [vmem:[#allocation8 + $0x1f8] sm:$0xff] }
 0x534   :  { %1001 = vmatpush.msra.mxu3 %v843_v12  ;;  %984 = vmatpush.msra.mxu1 %v786_v24  ;;  %v816_v12 = vld [vmem:[#allocation8 + $0x1a0] sm:$0xff] }
 0x535   :  { %711 = vmatpush.msra.mxu0 %v625_v16  ;;  %v752_v16 = vmul.f32 0.7978846, %v749_v34  ;;  %v811_v34 = vld [vmem:[#allocation8 + $0x178] sm:$0xff] }
 0x536   :  { %1002 = vmatpush.msra.mxu3 %v840_v20  ;;  %v771_v20 = vld [vmem:[#allocation8 + $0x38] sm:$0xff] }
 0x537   :  { %712 = vmatpush.msra.mxu0 %v622_v54  ;;  %v828_v54 = vld [vmem:[#allocation8 + $0x200] sm:$0xff]  ;;  %1803 = vtanh.f32 %v752_v16  ;;  %v898_v16 = vld [vmem:[#allocation8 + $0x430] sm:$0xff] }
 0x538   :  { %713 = vmatmul.f32.vlgmr.msra.gmra.mxu0 %v2256_v62  ;;  %v845_v62 = vld [vmem:[#allocation8 + $0x288] sm:$0xff]  ;;  %1003 = vmatpush.msra.mxu3 %v837_v28  ;;  %v863_v28 = vld [vmem:[#allocation8 + $0x318] sm:$0xff] }
 0x539   :  { %956 = vmatpush.msrb.mxu0 %v905_v56  ;;  %940 = vmatpush.msra.mxu2 %v845_v62  ;;  %v783_v56 = vld [vmem:[#allocation8 + $0x98] sm:$0xff]  ;;  %v872_v62 = vld [vmem:[#allocation8 + $0x360] sm:$0xff] }
 0x53a   :  { %1004 = vmatpush.msra.mxu3 %v834_v39  ;;  %985 = vmatpush.msra.mxu1 %v783_v56  ;;  %v900_v39 = vld [vmem:[#allocation8 + $0x440] sm:$0xff] }
 0x53b   :  { %957 = vmatpush.msrb.mxu0 %v902_v57  ;;  %941 = vmatpush.msra.mxu2 %v842_v8  ;;  %v821_v57 = vld [vmem:[#allocation8 + $0x1c8] sm:$0xff] }
 0x53c   :  { %1005 = vmatpush.msra.mxu3 %v831_v47  ;;  %986 = vmatpush.msra.mxu1 %v780_v59  ;;  %v869_v8 = vld [vmem:[#allocation8 + $0x348] sm:$0xff]  ;;  %v808_v47 = vld [vmem:[#allocation8 + $0x160] sm:$0xff]  ;;  %v850_v59 = vld [vmem:[#allocation8 + $0x2b0] sm:$0xff] }
 0x53d   :  { %958 = vmatpush.msrb.mxu0 %v899_v0  ;;  %942 = vmatpush.msra.mxu2 %v839_v13  ;;  %v777_v0 = vld [vmem:[#allocation8 + $0x68] sm:$0xff]  ;;  %v1804_v10 = vpop.eup %1803  ;;  %v812_v13 = vld [vmem:[#allocation8 + $0x180] sm:$0xff] }
 0x53e   :  { %1006 = vmatpush.msra.mxu3 %v828_v54  ;;  %987 = vmatpush.msra.mxu1 %v777_v0  ;;  %v758_v18 = vadd.f32 1.0, %v1804_v10  ;;  %v894_v54 = vld [vmem:[#allocation8 + $0x410] sm:$0xff]  ;;  %v673_v0 = vperm.slane %v2276_v60, 2 }
 0x53f   :  { %959 = vmatpush.msrb.mxu0 %v896_v9  ;;  %943 = vmatpush.msra.mxu2 %v836_v21  ;;  %v737_v9 = vmul.f32 0.5, %v2279_v2  ;;  %v813_v21 = vld [vmem:[#allocation8 + $0x188] sm:$0xff]  ;;  %v907_v2 = vld [vmem:[#allocation8 + $0x478] sm:$0xff] }
 0x540   :  { %1007 = vmatpush.msra.mxu3 %v825_v3  ;;  %988 = vmatpush.msra.mxu1 %v774_v11  ;;  %v895_v3 = vld [vmem:[#allocation8 + $0x418] sm:$0xff] }
 0x541   :  { %960 = vmatpush.msrb.mxu0 %v893_v14  ;;  %944 = vmatpush.msra.mxu2 %v833_v31  ;;  %v866_v14 = vld [vmem:[#allocation8 + $0x330] sm:$0xff]  ;;  %v904_v31 = vld [vmem:[#allocation8 + $0x460] sm:$0xff] }
 0x542   :  { %1008 = vmatpush.msra.mxu3 %v822_v61  ;;  %989 = vmatpush.msra.mxu1 %v771_v20 }
 0x543   :  { %961 = vmatpush.msrb.mxu0 %v890_v25  ;;  %945 = vmatpush.msra.mxu2 %v830_v43  ;;  %v2286_v25 = vmul.f32 %v758_v18, %v737_v9  ;;  %v859_v43 = vld [vmem:[#allocation8 + $0x2f8] sm:$0xff] }
 0x544   :  { %1009 = vmatpush.msra.mxu3 %v819_v4  ;;  %990 = vmatpush.msra.mxu1 %v768_v29  ;;  %v734_v4 = vpop.f32.mrf.mxu1  ;;  %v847_v9 = vld [vmem:[#allocation8 + $0x298] sm:$0xff]  ;;  %v793_v29 = vld [vmem:[#allocation8 + $0xe8] sm:$0xff] }
 0x545   :  { %962 = vmatpush.msrb.mxu0 %v887_v32  ;;  %946 = vmatpush.msra.mxu2 %v827_v48  ;;  %v860_v32 = vld [vmem:[#allocation8 + $0x300] sm:$0xff]  ;;  %v2300_v11 = vadd.f32 %v734_v4, %v673_v0  ;;  %v829_v0 = vld [vmem:[#allocation8 + $0x208] sm:$0xff]  ;;  %v871_v4 = vld [vmem:[#allocation8 + $0x358] sm:$0xff] }
 0x546   :  { %1010 = vmatpush.msra.mxu3 %v816_v12  ;;  %991 = vmatpush.msra.mxu1 %v765_v35  ;;  %v856_v48 = vld [vmem:[#allocation8 + $0x2e0] sm:$0xff]  ;;  %v889_v12 = vld [vmem:[#allocation8 + $0x3e8] sm:$0xff]  ;;  %v883_v35 = vld [vmem:[#allocation8 + $0x3b8] sm:$0xff] }
 0x547   :  { %963 = vmatpush.msrb.mxu0 %v884_v44  ;;  %947 = vmatpush.msra.mxu2 %v824_v55  ;;  %v901_v44 = vld [vmem:[#allocation8 + $0x448] sm:$0xff]  ;;  %v742_v20 = vmul.f32 0.044715, %v2300_v11 }
 0x548   :  { %1011 = vmatpush.msra.mxu3 %v813_v21  ;;  %1056 = vmatpush.msrb.mxu1 %v859_v43  ;;  %v805_v55 = vld [vmem:[#allocation8 + $0x148] sm:$0xff]  ;;  %v844_v21 = vld [vmem:[#allocation8 + $0x280] sm:$0xff] }
 0x549   :  { %964 = vmatpush.msrb.mxu0 %v881_v50  ;;  %948 = vmatpush.msra.mxu2 %v821_v57  ;;  %v1778_v50 = vld [vmem:[%s2456_s3 + $0x2] ss:$0 sm:$0xff]  ;;  %v891_v57 = vld [vmem:[#allocation8 + $0x3f8] sm:$0xff] }
 0x54a   :  { %932 = vmatmul.f32.vlgmr.msrb.gmra.mxu3 %v2286_v25  ;;  %1057 = vmatpush.msrb.mxu1 %v856_v48  ;;  %v876_v48 = vld [vmem:[#allocation8 + $0x380] sm:$0xff] }
 0x54b   :  { %965 = vmatpush.msrb.mxu0 %v878_v1  ;;  %949 = vmatpush.msra.mxu2 %v818_v63  ;;  %v853_v1 = vld [vmem:[#allocation8 + $0x2c8] sm:$0xff]  ;;  %v1779_v63 = vld [vmem:[%s2457_s4 + $0x2] ss:$0 sm:$0xff] }
 0x54c   :  { %1076 = vmatpush.msrb.mxu3 %v907_v2  ;;  %1058 = vmatpush.msrb.mxu1 %v853_v1 }
 0x54d   :  { %966 = vmatpush.msrb.mxu0 %v875_v58  ;;  %950 = vmatpush.msra.mxu2 %v815_v5  ;;  %v802_v58 = vld [vmem:[#allocation8 + $0x130] sm:$0xff]  ;;  %v888_v5 = vld [vmem:[#allocation8 + $0x3e0] sm:$0xff] }
 0x54e   :  { %1077 = vmatpush.msrb.mxu3 %v904_v31  ;;  %1059 = vmatpush.msrb.mxu1 %v850_v59  ;;  %v745_v31 = vmul.f32 %v742_v20, %v2300_v11  ;;  %v870_v59 = vld [vmem:[#allocation8 + $0x350] sm:$0xff]  ;;  %v861_v20 = vld [vmem:[#allocation8 + $0x308] sm:$0xff] }
 0x54f   :  { %967 = vmatpush.msrb.mxu0 %v872_v62  ;;  %951 = vmatpush.msra.mxu2 %v812_v13  ;;  %v892_v62 = vld [vmem:[#allocation8 + $0x400] sm:$0xff]  ;;  %v885_v13 = vld [vmem:[#allocation8 + $0x3c8] sm:$0xff] }
 0x550   :  { %1078 = vmatpush.msrb.mxu3 %v901_v44  ;;  %1060 = vmatpush.msrb.mxu1 %v847_v9  ;;  %v748_v44 = vmul.f32 %v745_v31, %v2300_v11  ;;  %v868_v9 = vld [vmem:[#allocation8 + $0x340] sm:$0xff]  ;;  %v739_v31 = vmul.f32 0.5, %v2300_v11 }
 0x551   :  { %968 = vmatpush.msrb.mxu0 %v869_v8  ;;  %1016 = vmatpush.msrb.mxu2 %v906_v27  ;;  %v799_v8 = vld [vmem:[#allocation8 + $0x118] sm:$0xff]  ;;  %v886_v27 = vld [vmem:[#allocation8 + $0x3d0] sm:$0xff] }
 0x552   :  { %1079 = vmatpush.msrb.mxu3 %v898_v16  ;;  %1061 = vmatpush.msrb.mxu1 %v844_v21  ;;  %v787_v16 = vld [vmem:[#allocation8 + $0xb8] sm:$0xff]  ;;  %v751_v1 = vadd.f32 %v748_v44, %v2300_v11  ;;  %v772_v21 = vld [vmem:[#allocation8 + $0x40] sm:$0xff]  ;;  %v1257_v44 = vld [vmem:[#allocation9 + $0x468] sm:$0xff] }
 0x553   :  { %969 = vmatpush.msrb.mxu0 %v866_v14  ;;  %1017 = vmatpush.msrb.mxu2 %v903_v30  ;;  %v796_v14 = vld [vmem:[#allocation8 + $0x100] sm:$0xff]  ;;  %v1206_v11 = vld [vmem:[#allocation9 + $0x2d0] sm:$0xff] }
 0x554   :  { %1080 = vmatpush.msrb.mxu3 %v895_v3  ;;  %v784_v3 = vld [vmem:[#allocation8 + $0xa0] sm:$0xff]  ;;  %992 = vmatmul.f32.vlgmr.msra.gmra.mxu1 %v2286_v25 }
 0x555   :  { %970 = vmatpush.msrb.mxu0 %v863_v28  ;;  %1018 = vmatpush.msrb.mxu2 %v900_v39  ;;  %v882_v28 = vld [vmem:[#allocation8 + $0x3b0] sm:$0xff]  ;;  %v879_v39 = vld [vmem:[#allocation8 + $0x398] sm:$0xff] }
 0x556   :  { %1081 = vmatpush.msrb.mxu3 %v892_v62  ;;  %v781_v62 = vld [vmem:[#allocation8 + $0x88] sm:$0xff] }
 0x557   :  { %971 = vmatpush.msrb.mxu0 %v860_v32  ;;  %1019 = vmatpush.msrb.mxu2 %v897_v46  ;;  %v841_v32 = vld [vmem:[#allocation8 + $0x268] sm:$0xff]  ;;  %v838_v46 = vld [vmem:[#allocation8 + $0x250] sm:$0xff] }
 0x558   :  { %1082 = vmatpush.msrb.mxu3 %v889_v12  ;;  %1062 = vmatpush.msrb.mxu1 %v841_v32  ;;  %v864_v12 = vld [vmem:[#allocation8 + $0x320] sm:$0xff] }
 0x559   :  { %1036 = vmatpush.msra.mxu0 %v811_v34  ;;  %1020 = vmatpush.msrb.mxu2 %v894_v54  ;;  %v790_v34 = vld [vmem:[#allocation8 + $0xd0] sm:$0xff]  ;;  %v835_v54 = vld [vmem:[#allocation8 + $0x238] sm:$0xff] }
 0x55a   :  { %1083 = vmatpush.msrb.mxu3 %v886_v27  ;;  %1063 = vmatpush.msrb.mxu1 %v838_v46  ;;  %v820_v27 = vld [vmem:[#allocation8 + $0x1c0] sm:$0xff]  ;;  %v672_v46 = vperm.slane %v2276_v60, 1  ;;  %v1197_v60 = vld [vmem:[#allocation9 + $0x288] sm:$0xff] }
 0x55b   :  { %1037 = vmatpush.msra.mxu0 %v808_v47  ;;  %1021 = vmatpush.msrb.mxu2 %v891_v57  ;;  %v880_v47 = vld [vmem:[#allocation8 + $0x3a0] sm:$0xff] }
 0x55c   :  { %1084 = vmatpush.msrb.mxu3 %v883_v35  ;;  %v832_v57 = vld [vmem:[#allocation8 + $0x220] sm:$0xff]  ;;  %1064 = vmatpush.msrb.mxu1 %v835_v54  ;;  %v766_v35 = vld [vmem:[#allocation8 + $0x10] sm:$0xff]  ;;  %v1251_v54 = vld [vmem:[#allocation9 + $0x438] sm:$0xff] }
 0x55d   :  { %1038 = vmatpush.msra.mxu0 %v805_v55  ;;  %1022 = vmatpush.msrb.mxu2 %v888_v5  ;;  %v877_v55 = vld [vmem:[#allocation8 + $0x388] sm:$0xff]  ;;  %v867_v5 = vld [vmem:[#allocation8 + $0x338] sm:$0xff] }
 0x55e   :  { %1085 = vmatpush.msrb.mxu3 %v880_v47  ;;  %1065 = vmatpush.msrb.mxu1 %v832_v57  ;;  %v1254_v47 = vld [vmem:[#allocation9 + $0x450] sm:$0xff] }
 0x55f   :  { %1039 = vmatpush.msra.mxu0 %v802_v58  ;;  %1023 = vmatpush.msrb.mxu2 %v885_v13  ;;  %v874_v58 = vld [vmem:[#allocation8 + $0x370] sm:$0xff]  ;;  %v775_v13 = vld [vmem:[#allocation8 + $0x58] sm:$0xff] }
 0x560   :  { %1086 = vmatpush.msrb.mxu3 %v877_v55  ;;  %1066 = vmatpush.msrb.mxu1 %v829_v0  ;;  %v1239_v0 = vld [vmem:[#allocation9 + $0x3d8] sm:$0xff] }
 0x561   :  { %1040 = vmatpush.msra.mxu0 %v799_v8  ;;  %1024 = vmatpush.msrb.mxu2 %v882_v28  ;;  %v826_v8 = vld [vmem:[#allocation8 + $0x1f0] sm:$0xff] }
 0x562   :  { %1087 = vmatpush.msrb.mxu3 %v874_v58  ;;  %1067 = vmatpush.msrb.mxu1 %v826_v8  ;;  %v862_v28 = vld [vmem:[#allocation8 + $0x310] sm:$0xff] }
 0x563   :  { %1041 = vmatpush.msra.mxu0 %v796_v14  ;;  %1025 = vmatpush.msrb.mxu2 %v879_v39  ;;  %v823_v14 = vld [vmem:[#allocation8 + $0x1d8] sm:$0xff]  ;;  %v814_v39 = vld [vmem:[#allocation8 + $0x190] sm:$0xff] }
 0x564   :  { %1088 = vmatpush.msrb.mxu3 %v871_v4  ;;  %1068 = vmatpush.msrb.mxu1 %v823_v14  ;;  %v1194_v58 = vld [vmem:[#allocation9 + $0x270] sm:$0xff]  ;;  %v1097_v14 = vld [vmem:[%s2464_s11] sm:$0x7] }
 0x565   :  { %1042 = vmatpush.msra.mxu0 %v793_v29  ;;  %1026 = vmatpush.msrb.mxu2 %v876_v48  ;;  %v769_v29 = vld [vmem:[#allocation8 + $0x28] sm:$0xff] }
 0x566   :  { %1089 = vmatpush.msrb.mxu3 %v868_v9  ;;  %1069 = vmatpush.msrb.mxu1 %v820_v27  ;;  %v1185_v9 = vld [vmem:[#allocation9 + $0x228] sm:$0xff]  ;;  %v1179_v27 = vld [vmem:[#allocation9 + $0x1f8] sm:$0xff] }
 0x567   :  { %1043 = vmatpush.msra.mxu0 %v790_v34 }
 0x569   :  { %1044 = vmatpush.msra.mxu0 %v787_v16  ;;  %v1203_v16 = vld [vmem:[#allocation9 + $0x2b8] sm:$0xff] }
 0x56b   :  { %1045 = vmatpush.msra.mxu0 %v784_v3  ;;  %v1245_v3 = vld [vmem:[#allocation9 + $0x408] sm:$0xff] }
 0x56d   :  { %1046 = vmatpush.msra.mxu0 %v781_v62  ;;  %v1191_v62 = vld [vmem:[#allocation9 + $0x258] sm:$0xff] }
 0x595   :  { %v547_v24 = vpop.f32.mrf.mxu0 }
 0x596   :  { %v553_v56 = vmul.f32 %v547_v24, %v2263_v53 }
 0x598   :  { %v560_v61 = vadd.f32 %v1778_v50, %v553_v56 }
 0x59a   :  { %v2298_v10 = vmul.f32 %v2231_v26, %v560_v61  ;;  %v754_v61 = vmul.f32 0.7978846, %v751_v1  ;;  %v1248_v1 = vld [vmem:[#allocation9 + $0x420] sm:$0xff] }
 0x59c   :  { %v569_v18 = vmul.f32 %v1779_v63, %v2298_v10  ;;  %1805 = vtanh.f32 %v754_v61 }
 0x59d   :  { %v550_v2 = vpop.f32.mrf.mxu0 }
 0x59e   :  { %v554_v30 = vmul.f32 %v550_v2, %v2261_v49  ;;  %571 = vadd.xlane.f32.xlu0 %v569_v18  ;;  %v865_v18 = vld [vmem:[#allocation8 + $0x328] sm:$0xff] }
 0x59f   :  { %1090 = vmatpush.msrb.mxu3 %v865_v18  ;;  %v1101_v18 = vpop.permute.xlu2 %1100 }
 0x5a0   :  { %v561_v43 = vadd.f32 %v1778_v50, %v554_v30  ;;  %v873_v50 = vld [vmem:[#allocation8 + $0x368] sm:$0xff] }
 0x5a1   :  { %1027 = vmatpush.msrb.mxu2 %v873_v50  ;;  %v817_v30 = vld [vmem:[#allocation8 + $0x1a8] sm:$0xff]  ;;  %1091 = vmatpush.msrb.mxu3 %v862_v28  ;;  %v1200_v50 = vld [vmem:[#allocation9 + $0x2a0] sm:$0xff] }
 0x5a2   :  { %v2308_v24 = vmul.f32 %v2225_v19, %v561_v43  ;;  %v1806_v2 = vpop.eup %1805  ;;  %1070 = vmatpush.msrb.mxu1 %v817_v30  ;;  %v1209_v43 = vld [vmem:[#allocation9 + $0x2e8] sm:$0xff]  ;;  %v1176_v30 = vld [vmem:[#allocation9 + $0x1e0] sm:$0xff] }
 0x5a3   :  { %1028 = vmatpush.msrb.mxu2 %v870_v59  ;;  %v760_v32 = vadd.f32 1.0, %v1806_v2  ;;  %v1242_v59 = vld [vmem:[#allocation9 + $0x3f0] sm:$0xff]  ;;  %v1105_v2 = vld [vmem:[%s2465_s12] sm:$0x7] }
 0x5a4   :  { %v570_v56 = vmul.f32 %v1779_v63, %v2308_v24  ;;  %v778_v63 = vld [vmem:[#allocation8 + $0x70] sm:$0xff]  ;;  %1071 = vmatpush.msrb.mxu1 %v814_v39 }
 0x5a5   :  { %1029 = vmatpush.msrb.mxu2 %v867_v5  ;;  %1047 = vmatpush.msra.mxu0 %v778_v63  ;;  %v2313_v34 = vmul.f32 %v760_v32, %v739_v31  ;;  %v1188_v5 = vld [vmem:[#allocation9 + $0x240] sm:$0xff] }
 0x5a6   :  { %573 = vadd.xlane.f32.xlu1 %v570_v56  ;;  %1315 = vmatpush.msra.mxu1 %v1257_v44  ;;  %v1236_v63 = vld [vmem:[#allocation9 + $0x3c0] sm:$0xff]  ;;  %v1221_v44 = vld [vmem:[#allocation9 + $0x348] sm:$0xff] }
 0x5a7   :  { %1030 = vmatpush.msrb.mxu2 %v864_v12  ;;  %1048 = vmatpush.msra.mxu0 %v775_v13  ;;  %v1233_v12 = vld [vmem:[#allocation9 + $0x3a8] sm:$0xff]  ;;  %v1182_v13 = vld [vmem:[#allocation9 + $0x210] sm:$0xff]  ;;  %v1224_v31 = vld [vmem:[#allocation9 + $0x360] sm:$0xff] }
 0x5a8   :  { %972 = vmatmul.f32.vlgmr.msrb.gmra.mxu0 %v2313_v34  ;;  %1316 = vmatpush.msra.mxu1 %v1254_v47  ;;  %v1162_v47 = vld [vmem:[#allocation9 + $0x170] sm:$0xff] }
 0x5a9   :  { %1031 = vmatpush.msrb.mxu2 %v861_v20  ;;  %1049 = vmatpush.msra.mxu0 %v772_v21  ;;  %v1227_v20 = vld [vmem:[#allocation9 + $0x378] sm:$0xff]  ;;  %v1103_v21 = vperm.slane %v1101_v18, 0 }
 0x5aa   :  { %1317 = vmatpush.msra.mxu1 %v1251_v54  ;;  %v1218_v54 = vld [vmem:[#allocation9 + $0x330] sm:$0xff]  ;;  %v1143_v18 = vld [vmem:[#allocation9 + $0xd8] sm:$0xff] }
 0x5ab   :  { %1050 = vmatpush.msra.mxu0 %v769_v29  ;;  %v1104_v29 = vmul.f32 %v1103_v21, %v1097_v14  ;;  %v1255_v14 = vld [vmem:[#allocation9 + $0x458] sm:$0xff]  ;;  %v1160_v21 = vld [vmem:[#allocation9 + $0x160] sm:$0xff] }
 0x5ac   :  { %1318 = vmatpush.msra.mxu1 %v1248_v1 }
 0x5ad   :  { %1051 = vmatpush.msra.mxu0 %v766_v35  ;;  %v2325_v39 = vadd.f32 %v1105_v2, %v1104_v29  ;;  %v1140_v2 = vld [vmem:[#allocation9 + $0xc0] sm:$0xff]  ;;  %v1249_v29 = vld [vmem:[#allocation9 + $0x428] sm:$0xff] }
 0x5ae   :  { %1319 = vmatpush.msra.mxu1 %v1245_v3  ;;  %v1155_v3 = vld [vmem:[#allocation9 + $0x138] sm:$0xff] }
 0x5af   :  { %1295 = vmatpush.msrb.mxu0 %v1209_v43  ;;  %v1173_v43 = vld [vmem:[#allocation9 + $0x1c8] sm:$0xff] }
 0x5b0   :  { %1052 = vmatmul.f32.vlgmr.msra.gmra.mxu0 %v2286_v25  ;;  %1320 = vmatpush.msra.mxu1 %v1242_v59  ;;  %v1230_v25 = vld [vmem:[#allocation9 + $0x390] sm:$0xff]  ;;  %v1164_v59 = vld [vmem:[#allocation9 + $0x180] sm:$0xff] }
 0x5b1   :  { %1296 = vmatpush.msrb.mxu0 %v1206_v11  ;;  %v1161_v11 = vld [vmem:[#allocation9 + $0x168] sm:$0xff] }
 0x5b2   :  { %1321 = vmatpush.msra.mxu1 %v1239_v0  ;;  %v1153_v0 = vld [vmem:[#allocation9 + $0x128] sm:$0xff] }
 0x5b3   :  { %1297 = vmatpush.msrb.mxu0 %v1203_v16  ;;  %v1170_v16 = vld [vmem:[#allocation9 + $0x1b0] sm:$0xff] }
 0x5b4   :  { %1322 = vmatpush.msra.mxu1 %v1236_v63  ;;  %v1150_v63 = vld [vmem:[#allocation9 + $0x110] sm:$0xff] }
 0x5b5   :  { %v714_v48 = vpop.f32.mrf.mxu0  ;;  %1298 = vmatpush.msrb.mxu0 %v1200_v50  ;;  %v1159_v50 = vld [vmem:[#allocation9 + $0x158] sm:$0xff] }
 0x5b6   :  { %v715_v55 = vadd.f32 %v714_v48, %v672_v46  ;;  %1323 = vmatpush.msra.mxu1 %v1233_v12  ;;  %v1108_v48 = vmul.f32 0.044715, %v2325_v39  ;;  %v1147_v12 = vld [vmem:[#allocation9 + $0xf8] sm:$0xff] }
 0x5b7   :  { %1299 = vmatpush.msrb.mxu0 %v1197_v60  ;;  %v1215_v60 = vld [vmem:[#allocation9 + $0x318] sm:$0xff] }
 0x5b8   :  { %v741_v56 = vmul.f32 0.044715, %v715_v55  ;;  %1324 = vmatpush.msra.mxu1 %v1230_v25  ;;  %v738_v28 = vmul.f32 0.5, %v715_v55  ;;  %v1109_v1 = vmul.f32 %v1108_v48, %v2325_v39  ;;  %v1163_v25 = vld [vmem:[#allocation9 + $0x178] sm:$0xff] }
 0x5b9   :  { %1300 = vmatpush.msrb.mxu0 %v1194_v58  ;;  %v1131_v48 = vld [vmem:[#allocation9 + $0x78] sm:$0xff] }
 0x5ba   :  { %v744_v57 = vmul.f32 %v741_v56, %v715_v55  ;;  %1325 = vmatpush.msra.mxu1 %v1227_v20  ;;  %v1167_v56 = vld [vmem:[#allocation9 + $0x198] sm:$0xff]  ;;  %v1110_v58 = vmul.f32 %v1109_v1, %v2325_v39  ;;  %v1144_v20 = vld [vmem:[#allocation9 + $0xe0] sm:$0xff]  ;;  %v1129_v1 = vld [vmem:[#allocation9 + $0x68] sm:$0xff] }
 0x5bb   :  { %1301 = vmatpush.msrb.mxu0 %v1191_v62  ;;  %v1152_v62 = vld [vmem:[#allocation9 + $0x120] sm:$0xff] }
 0x5bc   :  { %v747_v61 = vmul.f32 %v744_v57, %v715_v55  ;;  %1326 = vmatpush.msra.mxu1 %v1224_v31  ;;  %v1156_v57 = vld [vmem:[#allocation9 + $0x140] sm:$0xff]  ;;  %v1138_v31 = vld [vmem:[#allocation9 + $0xb0] sm:$0xff] }
 0x5bd   :  { %1302 = vmatpush.msrb.mxu0 %v1188_v5  ;;  %v1149_v5 = vld [vmem:[#allocation9 + $0x108] sm:$0xff] }
 0x5be   :  { %v750_v4 = vadd.f32 %v747_v61, %v715_v55  ;;  %1327 = vmatpush.msra.mxu1 %v1221_v44  ;;  %v1158_v55 = vld [vmem:[#allocation9 + $0x150] sm:$0xff]  ;;  %v1212_v61 = vld [vmem:[#allocation9 + $0x300] sm:$0xff]  ;;  %v1135_v44 = vld [vmem:[#allocation9 + $0x98] sm:$0xff] }
 0x5bf   :  { %1303 = vmatpush.msrb.mxu0 %v1185_v9  ;;  %v1146_v9 = vld [vmem:[#allocation9 + $0xf0] sm:$0xff] }
 0x5c0   :  { %v753_v8 = vmul.f32 0.7978846, %v750_v4  ;;  %1328 = vmatpush.msra.mxu1 %v1218_v54  ;;  %v1111_v4 = vadd.f32 %v1110_v58, %v2325_v39  ;;  %v1148_v54 = vld [vmem:[#allocation9 + $0x100] sm:$0xff]  ;;  %v1125_v58 = vld [vmem:[#allocation9 + $0x48] sm:$0xff] }
 0x5c1   :  { %1304 = vmatpush.msrb.mxu0 %v1182_v13 }
 0x5c2   :  { %1807 = vtanh.f32 %v753_v8  ;;  %1329 = vmatpush.msra.mxu1 %v1215_v60  ;;  %v1258_v8 = vld [vmem:[#allocation9 + $0x470] sm:$0xff]  ;;  %v1112_v13 = vmul.f32 0.7978846, %v1111_v4  ;;  %v1237_v60 = vld [vmem:[#allocation9 + $0x3c8] sm:$0xff]  ;;  %v1123_v4 = vld [vmem:[#allocation9 + $0x38] sm:$0xff] }
 0x5c3   :  { %1305 = vmatpush.msrb.mxu0 %v1179_v27  ;;  %v1252_v27 = vld [vmem:[#allocation9 + $0x440] sm:$0xff] }
 0x5c4   :  { %1330 = vmatpush.msra.mxu1 %v1212_v61  ;;  %1809 = vtanh.f32 %v1112_v13  ;;  %v1142_v61 = vld [vmem:[#allocation9 + $0xd0] sm:$0xff]  ;;  %v1228_v13 = vld [vmem:[#allocation9 + $0x380] sm:$0xff] }
 0x5c5   :  { %1306 = vmatpush.msrb.mxu0 %v1176_v30  ;;  %v1137_v30 = vld [vmem:[#allocation9 + $0xa8] sm:$0xff] }
 0x5c7   :  { %1307 = vmatpush.msrb.mxu0 %v1173_v43  ;;  %v1134_v43 = vld [vmem:[#allocation9 + $0x90] sm:$0xff] }
 0x5c8   :  { %v1808_v32 = vpop.eup %1807 }
 0x5c9   :  { %v759_v35 = vadd.f32 1.0, %v1808_v32  ;;  %1308 = vmatpush.msrb.mxu0 %v1170_v16  ;;  %v1154_v32 = vld [vmem:[#allocation9 + $0x130] sm:$0xff]  ;;  %v1132_v16 = vld [vmem:[#allocation9 + $0x80] sm:$0xff] }
 0x5cb   :  { %v762_v46 = vmul.f32 %v759_v35, %v738_v28  ;;  %1309 = vmatpush.msrb.mxu0 %v1167_v56  ;;  %v1141_v28 = vld [vmem:[#allocation9 + $0xc8] sm:$0xff]  ;;  %v1246_v35 = vld [vmem:[#allocation9 + $0x410] sm:$0xff] }
 0x5cc   :  { %v1145_v56 = vld [vmem:[#allocation9 + $0xe8] sm:$0xff] }
 0x5cd   :  { %952 = vmatmul.f32.vlgmr.msra.gmra.mxu2 %v762_v46  ;;  %1012 = vmatmul.f32.vlgmr.msra.gmra.mxu3 %v762_v46 }
 0x5ce   :  { %1275 = vmatpush.msra.mxu2 %v1161_v11  ;;  %1335 = vmatpush.msra.mxu3 %v1162_v47  ;;  %v1243_v11 = vld [vmem:[#allocation9 + $0x3f8] sm:$0xff]  ;;  %v1810_v47 = vpop.eup %1809 }
 0x5cf   :  { %1310 = vmatpush.msrb.mxu0 %v1164_v59  ;;  %1072 = vmatmul.f32.vlgmr.msrb.gmra.mxu1 %v762_v46  ;;  %v1151_v46 = vld [vmem:[#allocation9 + $0x118] sm:$0xff]  ;;  %v1126_v59 = vld [vmem:[#allocation9 + $0x50] sm:$0xff] }
 0x5d0   :  { %1276 = vmatpush.msra.mxu2 %v1158_v55  ;;  %1336 = vmatpush.msra.mxu3 %v1159_v50  ;;  %v1240_v55 = vld [vmem:[#allocation9 + $0x3e0] sm:$0xff] }
 0x5d1   :  { %1375 = vmatpush.msra.mxu0 %v1258_v8  ;;  %1395 = vmatpush.msrb.mxu1 %v1163_v25  ;;  %v1128_v50 = vld [vmem:[#allocation9 + $0x60] sm:$0xff] }
 0x5d2   :  { %1277 = vmatpush.msra.mxu2 %v1155_v3  ;;  %1337 = vmatpush.msra.mxu3 %v1156_v57  ;;  %v1107_v3 = vmul.f32 0.5, %v2325_v39  ;;  %v1114_v57 = vadd.f32 1.0, %v1810_v47  ;;  %v1120_v39 = vld [vmem:[#allocation9 + $0x20] sm:$0xff]  ;;  %v1199_v47 = vld [vmem:[#allocation9 + $0x298] sm:$0xff] }
 0x5d3   :  { %1376 = vmatpush.msra.mxu0 %v1255_v14  ;;  %1396 = vmatpush.msrb.mxu1 %v1160_v21  ;;  %v1116_v25 = vld [vmem:[#allocation9] sm:$0xff]  ;;  %v1117_v14 = vld [vmem:[#allocation9 + $0x8] sm:$0xff] }
 0x5d4   :  { %1278 = vmatpush.msra.mxu2 %v1152_v62  ;;  %1338 = vmatpush.msra.mxu3 %v1153_v0  ;;  %v1234_v62 = vld [vmem:[#allocation9 + $0x3b0] sm:$0xff]  ;;  %v1115_v8 = vmul.f32 %v1114_v57, %v1107_v3  ;;  %v1121_v3 = vld [vmem:[#allocation9 + $0x28] sm:$0xff] }
 0x5d5   :  { %1032 = vmatmul.f32.vlgmr.msrb.gmra.mxu2 %v2313_v34  ;;  %1092 = vmatmul.f32.vlgmr.msrb.gmra.mxu3 %v2313_v34  ;;  %v1157_v34 = vld [vmem:[#allocation9 + $0x148] sm:$0xff]  ;;  %v1122_v0 = vld [vmem:[#allocation9 + $0x30] sm:$0xff] }
 0x5d6   :  { %1279 = vmatpush.msra.mxu2 %v1149_v5  ;;  %1339 = vmatpush.msra.mxu3 %v1150_v63  ;;  %v1139_v5 = vld [vmem:[#allocation9 + $0xb8] sm:$0xff]  ;;  %v2334_v21 = vperm.slane %v1115_v8, 0  ;;  %v1213_v57 = vld [vmem:[#allocation9 + $0x308] sm:$0xff] }
 0x5d7   :  { %1377 = vmatpush.msra.mxu0 %v1252_v27  ;;  %1397 = vmatpush.msrb.mxu1 %v1157_v34  ;;  %v1231_v63 = vld [vmem:[#allocation9 + $0x398] sm:$0xff]  ;;  %v1225_v34 = vld [vmem:[#allocation9 + $0x368] sm:$0xff] }
 0x5d8   :  { %1280 = vmatpush.msra.mxu2 %v1146_v9  ;;  %1340 = vmatpush.msra.mxu3 %v1147_v12  ;;  %v1119_v9 = vld [vmem:[#allocation9 + $0x18] sm:$0xff]  ;;  %v1136_v12 = vld [vmem:[#allocation9 + $0xa0] sm:$0xff] }
 0x5d9   :  { %1378 = vmatpush.msra.mxu0 %v1249_v29  ;;  %1398 = vmatpush.msrb.mxu1 %v1154_v32  ;;  %v1207_v27 = vld [vmem:[#allocation9 + $0x2d8] sm:$0xff]  ;;  %v1204_v29 = vld [vmem:[#allocation9 + $0x2c0] sm:$0xff]  ;;  %v1130_v32 = vld [vmem:[#allocation9 + $0x70] sm:$0xff] }
 0x5da   :  { %1281 = vmatpush.msra.mxu2 %v1143_v18  ;;  %1341 = vmatpush.msra.mxu3 %v1144_v20  ;;  %v1210_v18 = vld [vmem:[#allocation9 + $0x2f0] sm:$0xff]  ;;  %v1211_v20 = vld [vmem:[#allocation9 + $0x2f8] sm:$0xff] }
 0x5db   :  { %1379 = vmatpush.msra.mxu0 %v1246_v35  ;;  %1399 = vmatpush.msrb.mxu1 %v1151_v46  ;;  %v1201_v35 = vld [vmem:[#allocation9 + $0x2a8] sm:$0xff]  ;;  %v1222_v46 = vld [vmem:[#allocation9 + $0x350] sm:$0xff] }
 0x5dc   :  { %1282 = vmatpush.msra.mxu2 %v1140_v2  ;;  %1342 = vmatpush.msra.mxu3 %v1141_v28  ;;  %v1208_v2 = vld [vmem:[#allocation9 + $0x2e0] sm:$0xff]  ;;  %v1133_v28 = vld [vmem:[#allocation9 + $0x88] sm:$0xff] }
 0x5dd   :  { %1380 = vmatpush.msra.mxu0 %v1243_v11  ;;  %1400 = vmatpush.msrb.mxu1 %v1148_v54  ;;  %v1198_v11 = vld [vmem:[#allocation9 + $0x290] sm:$0xff]  ;;  %v1195_v54 = vld [vmem:[#allocation9 + $0x278] sm:$0xff] }
 0x5de   :  { %1283 = vmatpush.msra.mxu2 %v1137_v30  ;;  %1343 = vmatpush.msra.mxu3 %v1138_v31  ;;  %v1205_v30 = vld [vmem:[#allocation9 + $0x2c8] sm:$0xff]  ;;  %v2338_v31 = vperm.slane %v1115_v8, 1 }
 0x5df   :  { %1381 = vmatpush.msra.mxu0 %v1240_v55  ;;  %1401 = vmatpush.msrb.mxu1 %v1145_v56  ;;  %v1196_v55 = vld [vmem:[#allocation9 + $0x280] sm:$0xff] }
 0x5e0   :  { %1284 = vmatpush.msra.mxu2 %v1134_v43  ;;  %1344 = vmatpush.msra.mxu3 %v1135_v44  ;;  %v1202_v43 = vld [vmem:[#allocation9 + $0x2b0] sm:$0xff]  ;;  %v2340_v44 = vperm.slane %v1115_v8, 2  ;;  %v1192_v56 = vld [vmem:[#allocation9 + $0x260] sm:$0xff]  ;;  %v1181_v8 = vld [vmem:[#allocation9 + $0x208] sm:$0xff] }
 0x5e1   :  { %1382 = vmatpush.msra.mxu0 %v1237_v60  ;;  %1402 = vmatpush.msrb.mxu1 %v1142_v61  ;;  %v1193_v60 = vld [vmem:[#allocation9 + $0x268] sm:$0xff]  ;;  %v1118_v61 = vld [vmem:[#allocation9 + $0x10] sm:$0xff] }
 0x5e2   :  { %1285 = vmatpush.msra.mxu2 %v1131_v48  ;;  %1345 = vmatpush.msra.mxu3 %v1132_v16  ;;  %v1127_v48 = vld [vmem:[#allocation9 + $0x58] sm:$0xff] }
 0x5e3   :  { %1383 = vmatpush.msra.mxu0 %v1234_v62  ;;  %1403 = vmatpush.msrb.mxu1 %v1139_v5  ;;  %v1219_v16 = vld [vmem:[#allocation9 + $0x338] sm:$0xff]  ;;  %v1186_v62 = vld [vmem:[#allocation9 + $0x230] sm:$0xff]  ;;  %v1184_v5 = vld [vmem:[#allocation9 + $0x220] sm:$0xff] }
 0x5e4   :  { %1286 = vmatpush.msra.mxu2 %v1128_v50  ;;  %1346 = vmatpush.msra.mxu3 %v1129_v1  ;;  %v1124_v50 = vld [vmem:[#allocation9 + $0x40] sm:$0xff] }
 0x5e5   :  { %1384 = vmatpush.msra.mxu0 %v1231_v63  ;;  %1404 = vmatpush.msrb.mxu1 %v1136_v12  ;;  %v1216_v1 = vld [vmem:[#allocation9 + $0x320] sm:$0xff]  ;;  %v1174_v12 = vld [vmem:[#allocation9 + $0x1d0] sm:$0xff] }
 0x5e6   :  { %1287 = vmatpush.msra.mxu2 %v1125_v58  ;;  %1347 = vmatpush.msra.mxu3 %v1126_v59  ;;  %v1189_v58 = vld [vmem:[#allocation9 + $0x248] sm:$0xff]  ;;  %v1190_v59 = vld [vmem:[#allocation9 + $0x250] sm:$0xff]  ;;  %v1180_v63 = vld [vmem:[#allocation9 + $0x200] sm:$0xff] }
 0x5e7   :  { %1385 = vmatpush.msra.mxu0 %v1228_v13  ;;  %1405 = vmatpush.msrb.mxu1 %v1133_v28  ;;  %v1175_v13 = vld [vmem:[#allocation9 + $0x1d8] sm:$0xff]  ;;  %v1256_v28 = vld [vmem:[#allocation9 + $0x460] sm:$0xff] }
 0x5e8   :  { %1288 = vmatpush.msra.mxu2 %v1122_v0  ;;  %1348 = vmatpush.msra.mxu3 %v1123_v4  ;;  %v1187_v0 = vld [vmem:[#allocation9 + $0x238] sm:$0xff] }
 0x5e9   :  { %1386 = vmatpush.msra.mxu0 %v1225_v34  ;;  %1406 = vmatpush.msrb.mxu1 %v1130_v32  ;;  %v1183_v4 = vld [vmem:[#allocation9 + $0x218] sm:$0xff]  ;;  %v1253_v34 = vld [vmem:[#allocation9 + $0x448] sm:$0xff] }
 0x5ea   :  { %1289 = vmatpush.msra.mxu2 %v1119_v9  ;;  %1349 = vmatpush.msra.mxu3 %v1120_v39  ;;  %v1177_v9 = vld [vmem:[#allocation9 + $0x1e8] sm:$0xff]  ;;  %v1178_v39 = vld [vmem:[#allocation9 + $0x1f0] sm:$0xff] }
 0x5eb   :  { %1311 = vmatmul.f32.vlgmr.msrb.gmra.mxu0 %v2338_v31  ;;  %1331 = vmatmul.f32.vlgmr.msra.gmra.mxu1 %v2340_v44 }
 0x5ec   :  { %1290 = vmatpush.msra.mxu2 %v1116_v25  ;;  %1350 = vmatpush.msra.mxu3 %v1117_v14  ;;  %v1171_v25 = vld [vmem:[#allocation9 + $0x1b8] sm:$0xff]  ;;  %v1172_v14 = vld [vmem:[#allocation9 + $0x1c0] sm:$0xff] }
 0x5ed   :  { %1291 = vmatmul.f32.vlgmr.msra.gmra.mxu2 %v2334_v21  ;;  %1351 = vmatmul.f32.vlgmr.msra.gmra.mxu3 %v2334_v21 }
 0x5ee   :  { %1355 = vmatpush.msrb.mxu2 %v1210_v18  ;;  %1415 = vmatpush.msrb.mxu3 %v1211_v20  ;;  %v1168_v18 = vld [vmem:[#allocation9 + $0x1a0] sm:$0xff]  ;;  %v1169_v20 = vld [vmem:[#allocation9 + $0x1a8] sm:$0xff] }
 0x5ef   :  { %1387 = vmatpush.msra.mxu0 %v1222_v46  ;;  %1407 = vmatpush.msrb.mxu1 %v1127_v48  ;;  %v1241_v46 = vld [vmem:[#allocation9 + $0x3e8] sm:$0xff] }
 0x5f0   :  { %1356 = vmatpush.msrb.mxu2 %v1207_v27  ;;  %1416 = vmatpush.msrb.mxu3 %v1208_v2  ;;  %v1165_v27 = vld [vmem:[#allocation9 + $0x188] sm:$0xff]  ;;  %v1259_v2 = vld [vmem:[#allocation9 + $0x478] sm:$0xff] }
 0x5f1   :  { %1388 = vmatpush.msra.mxu0 %v1219_v16  ;;  %1408 = vmatpush.msrb.mxu1 %v1124_v50  ;;  %v1235_v16 = vld [vmem:[#allocation9 + $0x3b8] sm:$0xff] }
 0x5f2   :  { %1357 = vmatpush.msrb.mxu2 %v1204_v29  ;;  %1417 = vmatpush.msrb.mxu3 %v1205_v30  ;;  %v1250_v29 = vld [vmem:[#allocation9 + $0x430] sm:$0xff]  ;;  %v1247_v30 = vld [vmem:[#allocation9 + $0x418] sm:$0xff] }
 0x5f3   :  { %1389 = vmatpush.msra.mxu0 %v1216_v1  ;;  %1409 = vmatpush.msrb.mxu1 %v1121_v3  ;;  %v1226_v3 = vld [vmem:[#allocation9 + $0x370] sm:$0xff] }
 0x5f4   :  { %1358 = vmatpush.msrb.mxu2 %v1201_v35  ;;  %1418 = vmatpush.msrb.mxu3 %v1202_v43  ;;  %v1244_v35 = vld [vmem:[#allocation9 + $0x400] sm:$0xff] }
 0x5f5   :  { %1390 = vmatpush.msra.mxu0 %v1213_v57  ;;  %1410 = vmatpush.msrb.mxu1 %v1118_v61  ;;  %v1220_v61 = vld [vmem:[#allocation9 + $0x340] sm:$0xff] }
 0x5f6   :  { %1359 = vmatpush.msrb.mxu2 %v1198_v11  ;;  %1419 = vmatpush.msrb.mxu3 %v1199_v47  ;;  %v1238_v11 = vld [vmem:[#allocation9 + $0x3d0] sm:$0xff] }
 0x5f7   :  { %1391 = vmatmul.f32.vlgmr.msra.gmra.mxu0 %v2340_v44  ;;  %1411 = vmatmul.f32.vlgmr.msrb.gmra.mxu1 %v2334_v21  ;;  %v1166_v21 = vld [vmem:[#allocation9 + $0x190] sm:$0xff] }
 0x5f8   :  { %1360 = vmatpush.msrb.mxu2 %v1195_v54  ;;  %1420 = vmatpush.msrb.mxu3 %v1196_v55  ;;  %v1232_v55 = vld [vmem:[#allocation9 + $0x3a0] sm:$0xff] }
 0x5fa   :  { %1361 = vmatpush.msrb.mxu2 %v1192_v56  ;;  %1421 = vmatpush.msrb.mxu3 %v1193_v60  ;;  %v1229_v60 = vld [vmem:[#allocation9 + $0x388] sm:$0xff] }
 0x5fc   :  { %1362 = vmatpush.msrb.mxu2 %v1189_v58  ;;  %1422 = vmatpush.msrb.mxu3 %v1190_v59  ;;  %v1223_v58 = vld [vmem:[#allocation9 + $0x358] sm:$0xff] }
 0x5fe   :  { %1363 = vmatpush.msrb.mxu2 %v1186_v62  ;;  %1423 = vmatpush.msrb.mxu3 %v1187_v0 }
 0x600   :  { %1364 = vmatpush.msrb.mxu2 %v1183_v4  ;;  %1424 = vmatpush.msrb.mxu3 %v1184_v5  ;;  %v1214_v4 = vld [vmem:[#allocation9 + $0x310] sm:$0xff]  ;;  %v2363_v5 = vld [vmem:[%s2463_s10] sm:$0x7] }
 0x602   :  { %1365 = vmatpush.msrb.mxu2 %v1180_v63  ;;  %1425 = vmatpush.msrb.mxu3 %v1181_v8  ;;  %v911_v8 = vperm.slane %v2363_v5, 1 }
 0x604   :  { %1366 = vmatpush.msrb.mxu2 %v1177_v9  ;;  %1426 = vmatpush.msrb.mxu3 %v1178_v39  ;;  %v993_v9 = vpop.f32.mrf.mxu1 }
 0x605   :  { %v994_v39 = vadd.f32 %v993_v9, %v911_v8 }
 0x606   :  { %1367 = vmatpush.msrb.mxu2 %v1174_v12  ;;  %1427 = vmatpush.msrb.mxu3 %v1175_v13 }
 0x608   :  { %1368 = vmatpush.msrb.mxu2 %v1171_v25  ;;  %1428 = vmatpush.msrb.mxu3 %v1172_v14  ;;  %v912_v14 = vperm.slane %v2363_v5, 2 }
 0x60a   :  { %1369 = vmatpush.msrb.mxu2 %v1168_v18  ;;  %1429 = vmatpush.msrb.mxu3 %v1169_v20 }
 0x60c   :  { %1370 = vmatpush.msrb.mxu2 %v1165_v27  ;;  %1430 = vmatpush.msrb.mxu3 %v1166_v21  ;;  %v933_v27 = vpop.f32.mrf.mxu3 }
 0x60d   :  { %1371 = vmatmul.f32.vlgmr.msrb.gmra.mxu2 %v2338_v31  ;;  %1431 = vmatmul.f32.vlgmr.msrb.gmra.mxu3 %v2338_v31 }
 0x60e   :  { %1435 = vmatpush.msra.mxu2 %v1259_v2 }
 0x610   :  { %1436 = vmatpush.msra.mxu2 %v1256_v28 }
 0x611   :  { %v2348_v32 = vpop.xlane.xlu0 %571 }
 0x612   :  { %1437 = vmatpush.msra.mxu2 %v1253_v34  ;;  %v579_v43 = vsel %vm577_vm4, %v2348_v32, -1e+30  ;;  %1811 = vtanh.f32 %v2348_v32 }
 0x613   :  { %v581_v31 = vmul.f32 %v2112_v41, %v579_v43 }
 0x614   :  { %1438 = vmatpush.msra.mxu2 %v1250_v29 }
 0x615   :  { %v583_v50 = vsel %vm129_vm0, %v581_v31, 0.0  ;;  %v1476_v31 = vld [vmem:[#allocation3 + $0x160] sm:$0xff] }
 0x616   :  { %1439 = vmatpush.msra.mxu2 %v1247_v30 }
 0x618   :  { %1440 = vmatpush.msra.mxu2 %v1244_v35 }
 0x619   :  { %v2354_v47 = vpop.xlane.xlu1 %573 }
 0x61a   :  { %1441 = vmatpush.msra.mxu2 %v1241_v46  ;;  %v580_v48 = vsel %vm578_vm5, %v2354_v47, -1e+30  ;;  %v1478_v46 = vld [vmem:[#allocation3 + $0x170] sm:$0xff]  ;;  %1813 = vtanh.f32 %v2354_v47 }
 0x61b   :  { %v582_v54 = vmul.f32 %v2115_v42, %v580_v48  ;;  %v1217_v42 = vld [vmem:[#allocation9 + $0x328] sm:$0xff] }
 0x61c   :  { %1442 = vmatpush.msra.mxu2 %v1238_v11  ;;  %v1477_v11 = vld [vmem:[#allocation3 + $0x168] sm:$0xff] }
 0x61d   :  { %v584_v1 = vsel %vm129_vm0, %v582_v54, 0.0  ;;  %v1473_v54 = vld [vmem:[#allocation3 + $0x148] sm:$0xff] }
 0x61e   :  { %1443 = vmatpush.msra.mxu2 %v1235_v16  ;;  %v585_v56 = vadd.f32 %v584_v1, %v583_v50  ;;  %v1474_v16 = vld [vmem:[#allocation3 + $0x150] sm:$0xff]  ;;  %v1471_v50 = vld [vmem:[#allocation3 + $0x138] sm:$0xff] }
 0x61f   :  { %v1470_v1 = vld [vmem:[#allocation3 + $0x130] sm:$0xff] }
 0x620   :  { %1444 = vmatpush.msra.mxu2 %v1232_v55  ;;  %v586_v41 = vrot.slane %v585_v56, 4  ;;  %v1472_v55 = vld [vmem:[#allocation3 + $0x140] sm:$0xff] }
 0x622   :  { %1445 = vmatpush.msra.mxu2 %v1229_v60  ;;  %v587_v57 = vadd.f32 %v586_v41, %v585_v56  ;;  %v1469_v56 = vld [vmem:[#allocation3 + $0x128] sm:$0xff]  ;;  %v1468_v60 = vld [vmem:[#allocation3 + $0x120] sm:$0xff]  ;;  %v1467_v41 = vld [vmem:[#allocation3 + $0x118] sm:$0xff] }
 0x624   :  { %1446 = vmatpush.msra.mxu2 %v1226_v3  ;;  %v588_v59 = vrot.slane %v587_v57, 2  ;;  %v1466_v3 = vld [vmem:[#allocation3 + $0x110] sm:$0xff] }
 0x625   :  { %v2374_v13 = vpop.f32.mrf.mxu0 }
 0x626   :  { %1447 = vmatpush.msra.mxu2 %v1223_v58  ;;  %v589_v62 = vadd.f32 %v588_v59, %v587_v57  ;;  %v1465_v57 = vld [vmem:[#allocation3 + $0x108] sm:$0xff]  ;;  %v1464_v58 = vld [vmem:[#allocation3 + $0x100] sm:$0xff] }
 0x627   :  { %v2387_v59 = vld [vmem:[%s2467_s14] sm:$0x7] }
 0x628   :  { %1448 = vmatpush.msra.mxu2 %v1220_v61  ;;  %v590_v0 = vrot.slane %v589_v62, 1  ;;  %v910_v61 = vperm.slane %v2363_v5, 0  ;;  %v1812_v5 = vpop.eup %1811 }
 0x629   :  { %v1814_v32 = vpop.eup %1813 }
 0x62a   :  { %1449 = vmatpush.msra.mxu2 %v1217_v42  ;;  %v591_v63 = vadd.f32 %v590_v0, %v589_v62  ;;  %v1269_v62 = vperm.slane %v2387_v59, 0  ;;  %v934_v0 = vadd.f32 %v933_v27, %v910_v61  ;;  %v1550_v61 = vld [vmem:[#allocation3 + $0x190] sm:$0xff] }
 0x62c   :  { %1450 = vmatpush.msra.mxu2 %v1214_v4  ;;  %vm595_vm6 = vcmp.eq.f32.partialorder %v591_v63, %v580_v48  ;;  %vm593_vm7 = vcmp.gt.f32.partialorder %v591_v63, %v580_v48  ;;  %vm594_vm8 = vcmp.eq.f32.partialorder %v591_v63, %v579_v43  ;;  %vm592_vm11 = vcmp.gt.f32.partialorder %v591_v63, %v579_v43  ;;  %v1479_v43 = vld [vmem:[#allocation3 + $0x178] sm:$0xff] }
 0x62d   :  { %1451 = vmatmul.f32.vlgmr.msra.gmra.mxu2 %v2340_v44  ;;  %vm597_vm10 = vmand %vm595_vm6, %vm230_vm13  ;;  %v1053_v18 = vpop.f32.mrf.mxu0  ;;  %1480 = vmatpush.msrb.mxu0 %v1479_v43  ;;  %v1475_v48 = vld [vmem:[#allocation3 + $0x158] sm:$0xff] }
 0x62e   :  { %vm599_vm12 = vmor %vm593_vm7, %vm597_vm10  ;;  %v1054_v20 = vadd.f32 %v1053_v18, %v912_v14 }
 0x62f   :  { %v1749_v12 = vsel %vm599_vm12, 1.0, %v1953_v40  ;;  %vm596_vm14 = vmand %vm594_vm8, %vm229_vm9  ;;  %1481 = vmatpush.msrb.mxu0 %v1478_v46  ;;  %v1563_v46 = vld [vmem:[#allocation3 + $0x1f8] sm:$0xff] }
 0x630   :  { %v607_v44 = vsel %vm129_vm0, %v1749_v12, 0.0  ;;  %vm598_vm15 = vmor %vm592_vm11, %vm596_vm14  ;;  %1564 = vmatpush.msra.mxu3 %v1563_v46  ;;  %v1640_v46 = vld [vmem:[#allocation3 + $0x240] sm:$0xff] }
 0x631   :  { %608 = vadd.xlane.f32.xlu1 %v607_v44  ;;  %v1748_v25 = vsel %vm598_vm15, 1.0, %v1953_v40  ;;  %1482 = vmatpush.msrb.mxu0 %v1477_v11  ;;  %v1562_v11 = vld [vmem:[#allocation3 + $0x1f0] sm:$0xff] }
 0x632   :  { %v604_v38 = vsel %vm129_vm0, %v1748_v25, 0.0  ;;  %1565 = vmatpush.msra.mxu3 %v1562_v11  ;;  %v1638_v11 = vld [vmem:[#allocation3 + $0x230] sm:$0xff] }
 0x633   :  { %605 = vadd.xlane.f32.xlu0 %v604_v38  ;;  %1483 = vmatpush.msrb.mxu0 %v1476_v31  ;;  %v1561_v31 = vld [vmem:[#allocation3 + $0x1e8] sm:$0xff] }
 0x634   :  { %1566 = vmatpush.msra.mxu3 %v1561_v31 }
 0x635   :  { %1484 = vmatpush.msrb.mxu0 %v1475_v48  ;;  %v1560_v48 = vld [vmem:[#allocation3 + $0x1e0] sm:$0xff] }
 0x636   :  { %1567 = vmatpush.msra.mxu3 %v1560_v48 }
 0x637   :  { %1485 = vmatpush.msrb.mxu0 %v1474_v16  ;;  %v1559_v16 = vld [vmem:[#allocation3 + $0x1d8] sm:$0xff] }
 0x638   :  { %1568 = vmatpush.msra.mxu3 %v1559_v16  ;;  %v1637_v16 = vld [vmem:[#allocation3 + $0x228] sm:$0xff] }
 0x639   :  { %1486 = vmatpush.msrb.mxu0 %v1473_v54 }
 0x63b   :  { %1487 = vmatpush.msrb.mxu0 %v1472_v55  ;;  %v1556_v55 = vld [vmem:[#allocation3 + $0x1c0] sm:$0xff] }
 0x63d   :  { %1488 = vmatpush.msrb.mxu0 %v1471_v50  ;;  %v1555_v50 = vld [vmem:[#allocation3 + $0x1b8] sm:$0xff] }
 0x63f   :  { %1489 = vmatpush.msrb.mxu0 %v1470_v1  ;;  %v1554_v1 = vld [vmem:[#allocation3 + $0x1b0] sm:$0xff] }
 0x641   :  { %1490 = vmatpush.msrb.mxu0 %v1469_v56 }
 0x643   :  { %1491 = vmatpush.msrb.mxu0 %v1468_v60 }
 0x645   :  { %1492 = vmatpush.msrb.mxu0 %v1467_v41 }
 0x647   :  { %1493 = vmatpush.msrb.mxu0 %v1466_v3  ;;  %v1553_v3 = vld [vmem:[#allocation3 + $0x1a8] sm:$0xff] }
 0x649   :  { %1494 = vmatpush.msrb.mxu0 %v1465_v57  ;;  %v1552_v57 = vld [vmem:[#allocation3 + $0x1a0] sm:$0xff] }
 0x64b   :  { %1495 = vmatpush.msrb.mxu0 %v1464_v58  ;;  %v1551_v58 = vld [vmem:[#allocation3 + $0x198] sm:$0xff] }
 0x64c   :  { %v1073_v36 = vpop.f32.mrf.mxu1 }
 0x64d   :  { %v1074_v28 = vadd.f32 %v1073_v36, %v1054_v20 }
 0x650   :  { %v1013_v21 = vpop.f32.mrf.mxu3  ;;  %v953_v2 = vpop.f32.mrf.mxu2 }
 0x651   :  { %v1014_v37 = vadd.f32 %v1013_v21, %v994_v39  ;;  %v954_v8 = vadd.f32 %v953_v2, %v934_v0  ;;  %v1270_v0 = vperm.slane %v2387_v59, 1 }
 0x653   :  { %v974_v25 = vadd.f32 %v2374_v13, %v954_v8 }
 0x655   :  { %v1455_v27 = vperm.slane %v974_v25, 0 }
 0x658   :  { %v1093_v34 = vpop.f32.mrf.mxu3  ;;  %v1033_v29 = vpop.f32.mrf.mxu2 }
 0x659   :  { %v2380_v30 = vadd.f32 %v1093_v34, %v1074_v28  ;;  %v2382_v35 = vadd.f32 %v1033_v29, %v1014_v37 }
 0x668   :  { %v1312_v63 = vpop.f32.mrf.mxu0  ;;  %v1332_v12 = vpop.f32.mrf.mxu1 }
 0x670   :  { %v1292_v42 = vpop.f32.mrf.mxu2 }
 0x671   :  { %v1293_v4 = vadd.f32 %v1292_v42, %v1269_v62  ;;  %v1549_v62 = vld [vmem:[#allocation3 + $0x188] sm:$0xff]  ;;  %v1548_v42 = vld [vmem:[#allocation3 + $0x180] sm:$0xff] }
 0x673   :  { %v1313_v9 = vadd.f32 %v1312_v63, %v1293_v4  ;;  %v1352_v4 = vpop.f32.mrf.mxu3 }
 0x674   :  { %v1353_v63 = vadd.f32 %v1352_v4, %v1270_v0 }
 0x675   :  { %v1333_v38 = vadd.f32 %v1332_v12, %v1313_v9 }
 0x677   :  { %v1458_v21 = vperm.slane %v1333_v38, 0  ;;  %v1539_v38 = vperm.slane %v2382_v35, 0  ;;  %v1646_v35 = vld [vmem:[#allocation3 + $0x270] sm:$0xff] }
 0x6a4   :  { %v609_v39 = vpop.xlane.xlu1 %608 }
 0x6a5   :  { %vm611_vm9 = vcmp.lt.f32.partialorder %v609_v39, 1.0 }
 0x6a6   :  { %v606_v44 = vpop.xlane.xlu0 %605  ;;  %v1751_v14 = vsel %vm611_vm9, 1.0, %v1953_v40 }
 0x6a7   :  { %vm610_vm13 = vcmp.lt.f32.partialorder %v606_v44, 1.0  ;;  %v617_v2 = vmul.f32 %v1814_v32, %v1751_v14  ;;  %v1460_v29 = vmul.f32 %v1751_v14, %v1458_v21 }
 0x6a8   :  { %v1750_v18 = vsel %vm610_vm13, 1.0, %v1953_v40  ;;  %v1392_v40 = vpop.f32.mrf.mxu0 }
 0x6a9   :  { %v616_v20 = vmul.f32 %v1812_v5, %v1750_v18  ;;  %v1459_v37 = vmul.f32 %v1750_v18, %v1458_v21  ;;  %v619_v28 = vmul.f32 %v617_v2, %v2308_v24  ;;  %v1557_v24 = vld [vmem:[#allocation3 + $0x1c8] sm:$0xff] }
 0x6ab   :  { %v618_v47 = vmul.f32 %v616_v20, %v2298_v10  ;;  %v1457_v13 = vmul.f32 %v1455_v27, %v619_v28  ;;  %v1558_v10 = vld [vmem:[#allocation3 + $0x1d0] sm:$0xff]  ;;  %v1432_v28 = vpop.f32.mrf.mxu3 }
 0x6ac   :  { %1569 = vmatpush.msra.mxu3 %v1558_v10  ;;  %v1636_v10 = vld [vmem:[#allocation3 + $0x220] sm:$0xff] }
 0x6ad   :  { %v1456_v36 = vmul.f32 %v1455_v27, %v618_v47  ;;  %v1462_v43 = vadd.f32 %v1460_v29, %v1457_v13  ;;  %v1643_v13 = vld [vmem:[#allocation3 + $0x258] sm:$0xff] }
 0x6ae   :  { %1570 = vmatpush.msra.mxu3 %v1557_v24  ;;  %v1634_v24 = vld [vmem:[#allocation3 + $0x210] sm:$0xff] }
 0x6af   :  { %v1461_v34 = vadd.f32 %v1459_v37, %v1456_v36  ;;  %v1647_v37 = vld [vmem:[#allocation3 + $0x278] sm:$0xff] }
 0x6b0   :  { %1571 = vmatpush.msra.mxu3 %v1556_v55  ;;  %1648 = vmatpush.msra.mxu1 %v1647_v37  ;;  %v1633_v55 = vld [vmem:[#allocation3 + $0x208] sm:$0xff] }
 0x6b1   :  { %1496 = vmatmul.f32.vlgmr.msrb.gmra.mxu0 %v1461_v34  ;;  %v1645_v34 = vld [vmem:[#allocation3 + $0x268] sm:$0xff] }
 0x6b2   :  { %1572 = vmatpush.msra.mxu3 %v1555_v50  ;;  %1649 = vmatpush.msra.mxu1 %v1646_v35  ;;  %v1632_v50 = vld [vmem:[#allocation3 + $0x200] sm:$0xff] }
 0x6b4   :  { %1573 = vmatpush.msra.mxu3 %v1554_v1  ;;  %1650 = vmatpush.msra.mxu1 %v1645_v34  ;;  %v1271_v1 = vperm.slane %v2387_v59, 2 }
 0x6b6   :  { %1574 = vmatpush.msra.mxu3 %v1553_v3 }
 0x6b8   :  { %1575 = vmatpush.msra.mxu3 %v1552_v57 }
 0x6b9   :  { %1499 = vmatmul.f32.gmra.mxu0 %v1462_v43  ;;  %v1641_v43 = vld [vmem:[#allocation3 + $0x248] sm:$0xff] }
 0x6ba   :  { %1576 = vmatpush.msra.mxu3 %v1551_v58 }
 0x6bc   :  { %1577 = vmatpush.msra.mxu3 %v1550_v61 }
 0x6be   :  { %1578 = vmatpush.msra.mxu3 %v1549_v62 }
 0x6c0   :  { %1579 = vmatpush.msra.mxu3 %v1548_v42  ;;  %v1623_v42 = vperm.slane %v2380_v30, 0 }
 0x72e   :  { %v1497_v54 = vpop.f32.mrf.mxu0 }
 0x72f   :  { %v1503_v41 = vmul.f32 %v1497_v54, %v2263_v53  ;;  %v1635_v54 = vld [vmem:[#allocation3 + $0x218] sm:$0xff] }
 0x736   :  { %v1500_v56 = vpop.f32.mrf.mxu0 }
 0x737   :  { %v1504_v60 = vmul.f32 %v1500_v56, %v2261_v49  ;;  %v1412_v56 = vpop.f32.mrf.mxu1 }
 0x739   :  { %1519 = vmatpush.msra.mxu0 %v1504_v60 }
 0x73b   :  { %1520 = vmatpush.msra.mxu0 %v1503_v41 }
 0x73c   :  { %1752 = vmatmul.msk.f32.vlgmr.msra.gmra.mxu0 %vm129_vm0, %v2247_v52  ;;  %v1372_v52 = vpop.f32.mrf.mxu2 }
 0x73d   :  { %v1373_v8 = vadd.f32 %v1372_v52, %v1353_v63 }
 0x73f   :  { %v1393_v9 = vadd.f32 %v1392_v40, %v1373_v8 }
 0x741   :  { %v1542_v44 = vperm.slane %v1393_v9, 0 }
 0x743   :  { %v1543_v14 = vmul.f32 %v2231_v26, %v1542_v44 }
 0x744   :  { %1753 = vmatmul.msk.f32.gmra.mxu0 %vm129_vm0, %v2245_v51  ;;  %v1780_v51 = vld [vmem:[%s2456_s3 + $0x3] ss:$0 sm:$0xff]  ;;  %v1452_v60 = vpop.f32.mrf.mxu2 }
 0x7b9   :  { %v1522_v39 = vpop.f32.mrf.mxu0 }
 0x7ba   :  { %v1528_v12 = vmul.f32 %v1522_v39, %v2263_v53  ;;  %v1544_v53 = vmul.f32 %v2225_v19, %v1542_v44 }
 0x7bc   :  { %v1535_v25 = vadd.f32 %v1780_v51, %v1528_v12 }
 0x7be   :  { %v1537_v5 = vmul.f32 %v2231_v26, %v1535_v25  ;;  %v1644_v26 = vld [vmem:[#allocation3 + $0x260] sm:$0xff] }
 0x7bf   :  { %1651 = vmatpush.msra.mxu1 %v1644_v26 }
 0x7c0   :  { %v1540_v18 = vmul.f32 %v1539_v38, %v1537_v5 }
 0x7c1   :  { %v1525_v20 = vpop.f32.mrf.mxu0  ;;  %1652 = vmatpush.msra.mxu1 %v1643_v13 }
 0x7c2   :  { %v1529_v32 = vmul.f32 %v1525_v20, %v2261_v49  ;;  %v1545_v27 = vadd.f32 %v1543_v14, %v1540_v18  ;;  %v1642_v49 = vld [vmem:[#allocation3 + $0x250] sm:$0xff] }
 0x7c3   :  { %1653 = vmatpush.msra.mxu1 %v1642_v49 }
 0x7c4   :  { %v1536_v21 = vadd.f32 %v1780_v51, %v1529_v32  ;;  %1580 = vmatmul.f32.vlgmr.msra.gmra.mxu3 %v1545_v27 }
 0x7c5   :  { %1654 = vmatpush.msra.mxu1 %v1641_v43 }
 0x7c6   :  { %v1538_v2 = vmul.f32 %v2225_v19, %v1536_v21  ;;  %v1639_v19 = vld [vmem:[#allocation3 + $0x238] sm:$0xff] }
 0x7c7   :  { %1655 = vmatpush.msra.mxu1 %v1640_v46 }
 0x7c8   :  { %v1541_v47 = vmul.f32 %v1539_v38, %v1538_v2  ;;  %v1782_v38 = vld [vmem:[%s2456_s3 + $0x5] ss:$0 sm:$0xff] }
 0x7c9   :  { %1656 = vmatpush.msra.mxu1 %v1639_v19 }
 0x7ca   :  { %v1546_v36 = vadd.f32 %v1544_v53, %v1541_v47 }
 0x7cb   :  { %1657 = vmatpush.msra.mxu1 %v1638_v11 }
 0x7cc   :  { %1583 = vmatmul.f32.gmra.mxu3 %v1546_v36 }
 0x7cd   :  { %1658 = vmatpush.msra.mxu1 %v1637_v16 }
 0x7cf   :  { %1659 = vmatpush.msra.mxu1 %v1636_v10 }
 0x7d1   :  { %1660 = vmatpush.msra.mxu1 %v1635_v54 }
 0x7d3   :  { %1661 = vmatpush.msra.mxu1 %v1634_v24 }
 0x7d5   :  { %1662 = vmatpush.msra.mxu1 %v1633_v55 }
 0x7d7   :  { %1663 = vmatpush.msra.mxu1 %v1632_v50 }
 0x847   :  { %v1581_v29 = vpop.f32.mrf.mxu3 }
 0x848   :  { %v1587_v48 = vmul.f32 %v1581_v29, %v2177_v7 }
 0x84f   :  { %v1584_v40 = vpop.f32.mrf.mxu3 }
 0x850   :  { %v1588_v31 = vmul.f32 %v1584_v40, %v2175_v6 }
 0x852   :  { %1603 = vmatpush.msrb.mxu2 %v1588_v31 }
 0x854   :  { %1604 = vmatpush.msrb.mxu2 %v1587_v48 }
 0x855   :  { %1755 = vmatmul.msk.f32.vlgmr.msrb.gmra.mxu2 %vm129_vm0, %v2165_v45  ;;  %v1413_v45 = vadd.f32 %v1412_v56, %v1271_v1 }
 0x857   :  { %v1433_v41 = vadd.f32 %v1432_v28, %v1413_v45 }
 0x859   :  { %v1453_v3 = vadd.f32 %v1452_v60, %v1433_v41 }
 0x85b   :  { %v1626_v61 = vperm.slane %v1453_v3, 0 }
 0x85d   :  { %1756 = vmatmul.msk.f32.gmra.mxu2 %vm129_vm0, %v2167_v33  ;;  %v1781_v33 = vld [vmem:[%s2456_s3 + $0x4] ss:$0 sm:$0xff]  ;;  %v1627_v59 = vmul.f32 %v2145_v15, %v1626_v61  ;;  %v1628_v39 = vmul.f32 %v2153_v22, %v1626_v61 }
 0x8d8   :  { %v1606_v57 = vpop.f32.mrf.mxu2 }
 0x8d9   :  { %v1612_v58 = vmul.f32 %v1606_v57, %v2177_v7 }
 0x8db   :  { %v1619_v62 = vadd.f32 %v1781_v33, %v1612_v58 }
 0x8dd   :  { %v1621_v0 = vmul.f32 %v2145_v15, %v1619_v62 }
 0x8df   :  { %v1624_v4 = vmul.f32 %v1623_v42, %v1621_v0 }
 0x8e0   :  { %v1609_v63 = vpop.f32.mrf.mxu2 }
 0x8e1   :  { %v1613_v52 = vmul.f32 %v1609_v63, %v2175_v6  ;;  %v1629_v8 = vadd.f32 %v1627_v59, %v1624_v4  ;;  %v1815_v6 = vld [vmem:[%s2453_s0] sm:$0xff] }
 0x8e3   :  { %v1620_v9 = vadd.f32 %v1781_v33, %v1613_v52  ;;  %1664 = vmatmul.f32.vlgmr.msra.gmra.mxu1 %v1629_v8 }
 0x8e5   :  { %v1622_v51 = vmul.f32 %v2153_v22, %v1620_v9  ;;  %v1816_v22 = vld [vmem:[%s2453_s0 + $0x8] sm:$0xff] }
 0x8e7   :  { %v1625_v7 = vmul.f32 %v1623_v42, %v1622_v51 }
 0x8e9   :  { %v1630_v12 = vadd.f32 %v1628_v39, %v1625_v7 }
 0x8eb   :  { %1667 = vmatmul.f32.gmra.mxu1 %v1630_v12 }
 0x960   :  { %v1665_v44 = vpop.f32.mrf.mxu1 }
 0x961   :  { %v1671_v15 = vmul.f32 %v1665_v44, %v2077_v23 }
 0x968   :  { %v1668_v30 = vpop.f32.mrf.mxu1 }
 0x969   :  { %v1672_v25 = vmul.f32 %v1668_v30, %v2071_v17 }
 0x96b   :  { %1687 = vmatpush.msra.mxu2 %v1672_v25 }
 0x96d   :  { %1688 = vmatpush.msra.mxu2 %v1671_v15 }
 0x96e   :  { %1758 = vmatmul.msk.f32.vlgmr.msra.gmra.mxu2 %vm129_vm0, %v1815_v6 }
 0x976   :  { %1759 = vmatmul.msk.f32.gmra.mxu2 %vm129_vm0, %v1816_v22 }
 0x9f1   :  { %v1690_v5 = vpop.f32.mrf.mxu2 }
 0x9f2   :  { %v1696_v14 = vmul.f32 %v1690_v5, %v2077_v23 }
 0x9f4   :  { %v1703_v18 = vadd.f32 %v1782_v38, %v1696_v14 }
 0x9f6   :  { %1705 = vst [vmem:[#allocation11] sm:$0xff] %v1703_v18 }
 0x9f9   :  { %v1693_v20 = vpop.f32.mrf.mxu2 }
 0x9fa   :  { %v1697_v32 = vmul.f32 %v1693_v20, %v2071_v17 }
 0x9fc   :  { %v1704_v27 = vadd.f32 %v1782_v38, %v1697_v32 }
 0x9fe   :  { %1706 = vst [vmem:[#allocation11 + $0x8] sm:$0xff] %v1704_v27 }
 0x9ff   :  { %1719 = dma.vmem_to_hbm [thread:$0]  %s1712_s24, 256, %s1714_s8, [#allocation5], %s1949_s16, %s1949_s16, %s1950_s17  }
 0xa00   :  { %1943 = dma.done.wait [#allocation5], 256  }
 0xa01   :  { %1944 = vsyncadd [#allocation5], 4294967040 }
 0xa02   :  { %1724 = vsyncpa [#allocation4], 1 }
 0xa03   :  { %1725 = vsyncpa [#allocation7], 1 }
 0xa04   :  { %1726 = vsyncpa [#allocation10], 1 }
 0xa05   :  { %1727 = vsyncpa [#allocation5], 1 }

</bundles_post_ra>
